<compile_context>
chip_gen: v7x
topology: tpu7x:2x2x1
jax: 0.10.0
libtpu: 0.0.40
codegen_flags: <defaults>
</compile_context>

<pallas_src>
import functools

import jax
import jax.numpy as jnp
from jax.experimental import pallas as pl
from jax.experimental.pallas import tpu as pltpu


def autopad(k, p=None, d=1):
    """Pad to 'same' shape outputs (mirrors the PyTorch helper)."""
    if d > 1:
        k = d * (k - 1) + 1 if isinstance(k, int) else [d * (x - 1) + 1 for x in k]
    if p is None:
        p = k // 2 if isinstance(k, int) else [x // 2 for x in k]
    return p


def _round_up(x, m):
    return (x + m - 1) // m * m


# ---------------------------------------------------------------------------
# Pallas kernel: in-VMEM im2col (k*k shifted matmuls) + folded-BN bias + SiLU
# ---------------------------------------------------------------------------
def _conv_bn_silu_kernel(x_ref, w_ref, b_ref, o_ref, *, k, s, Ho, Wo, C1, apply_act):
    # x_ref: (1, Hp, Wp, C1) bf16 padded NHWC image (whole image resident in VMEM)
    # w_ref: (k*k*C1, tn)    bf16 weight with BN scale folded in (rows ordered (ki, kj, cin))
    # b_ref: (1, tn)         f32 folded BN bias
    # o_ref: (1, Ho*Wo, tn)  f32 output tile (lane-dense: tn is a multiple of 128)
    tn = o_ref.shape[-1]

    # Upcast once to f32: slicing/reshaping on unpacked 32-bit layouts is the most conservative
    # path; MXU operands are cast back to bf16 right before each dot.
    x = x_ref[0].astype(jnp.float32)                       # (Hp, Wp, C1)

    acc = jnp.zeros((Ho * Wo, tn), jnp.float32)
    for ki in range(k):                                    # implicit GEMM: k*k shifted matmuls
        for kj in range(k):
            # NOTE: only exercised with s == 1 here (plain contiguous slices).
            sl = x[ki:ki + (Ho - 1) * s + 1:s,
                   kj:kj + (Wo - 1) * s + 1:s, :]          # (Ho, Wo, C1)
            patch = sl.reshape(Ho * Wo, C1).astype(jnp.bfloat16)
            w_tap = w_ref[(ki * k + kj) * C1:(ki * k + kj + 1) * C1, :]     # (C1, tn) bf16
            acc = acc + jnp.dot(patch, w_tap, preferred_element_type=jnp.float32)

    y = acc + b_ref[...]                                   # folded BatchNorm (scale already in W)
    if apply_act:
        y = y * jax.nn.sigmoid(y)                          # SiLU
    o_ref[0] = y.astype(o_ref.dtype)


# ---------------------------------------------------------------------------
# Conv module equivalent
# ---------------------------------------------------------------------------
class ConvPallas:
    """Equivalent of ultralytics Conv: Conv2d(bias=False) + BatchNorm2d(eval) + SiLU."""

    def __init__(self, c1, c2, k=1, s=1, p=None, g=1, d=1, act=True, key=None):
        assert g == 1, "grouped conv not needed for this synthetic instance"
        assert d == 1, "dilation>1 not needed for this synthetic instance"
        self.c1, self.c2, self.k, self.s = c1, c2, k, s
        self.p = autopad(k, p, d)
        self.act = bool(act)

        key = jax.random.PRNGKey(0) if key is None else key
        kw, kb = jax.random.split(key)
        # Conv2d weight, PyTorch layout [c2, c1, kh, kw], deterministic init.
        fan_in = c1 * k * k
        bound = 1.0 / (fan_in ** 0.5)
        self.weight = jax.random.uniform(kw, (c2, c1, k, k), jnp.float32, -bound, bound)
        # BatchNorm2d params (eval mode, deterministic non-trivial values).
        self.bn_gamma = jnp.linspace(0.5, 1.5, c2, dtype=jnp.float32)
        self.bn_beta = jnp.linspace(-0.2, 0.2, c2, dtype=jnp.float32)
        self.bn_mean = 0.1 * jax.random.normal(kb, (c2,), jnp.float32)
        self.bn_var = jnp.linspace(0.8, 1.2, c2, dtype=jnp.float32)
        self.bn_eps = 1e-5  # nn.BatchNorm2d default

        # ---- one-time: fold BN into weight/bias, pad C2 lane-dense, cast weight to bf16 ----
        scale = self.bn_gamma / jnp.sqrt(self.bn_var + self.bn_eps)               # (c2,)
        bias = self.bn_beta - self.bn_mean * scale                                # (c2,)
        w_kkc = jnp.transpose(self.weight, (2, 3, 1, 0)).reshape(k * k * c1, c2)  # rows: (ki,kj,cin)
        w_folded = w_kkc * scale[None, :]
        self.c2p = _round_up(c2, 128)                                             # lane-dense C2
        self.w_folded = jnp.pad(w_folded, ((0, 0), (0, self.c2p - c2))).astype(jnp.bfloat16)
        self.bias_padded = jnp.pad(bias, (0, self.c2p - c2)).reshape(1, self.c2p).astype(jnp.float32)

    def __call__(self, x_nchw):
        N, C, H, W = x_nchw.shape
        assert C == self.c1
        k, s, p = self.k, self.s, self.p
        Ho = (H + 2 * p - k) // s + 1
        Wo = (W + 2 * p - k) // s + 1
        Hp, Wp = H + 2 * p, W + 2 * p
        C2p = self.c2p
        K = k * k * self.c1
        tn = 256 if C2p % 256 == 0 else 128   # MXU-friendly N tile (multiple of 128, 256 when possible)

        # Single fused XLA prologue: NCHW -> NHWC, spatial zero-pad, bf16 cast.
        # No im2col patch matrix is ever materialized in HBM.
        x = jnp.transpose(x_nchw, (0, 2, 3, 1))
        xp = jnp.pad(x, ((0, 0), (p, p), (p, p), (0, 0))).astype(jnp.bfloat16)

        kernel = functools.partial(
            _conv_bn_silu_kernel,
            k=k, s=s, Ho=Ho, Wo=Wo, C1=self.c1, apply_act=self.act)

        cost = pl.CostEstimate(
            flops=2 * N * Ho * Wo * K * C2p,
            transcendentals=N * Ho * Wo * C2p,                 # sigmoid
            bytes_accessed=(N * Hp * Wp * self.c1) * 2         # bf16 activations
                           + K * C2p * 2                       # bf16 weight
                           + C2p * 4                           # bias
                           + N * Ho * Wo * C2p * 4,            # f32 output
        )

        out_flat = pl.pallas_call(
            kernel,
            out_shape=jax.ShapeDtypeStruct((N, Ho * Wo, C2p), jnp.float32),
            grid_spec=pltpu.PrefetchScalarGridSpec(
                num_scalar_prefetch=0,
                grid=(N, C2p // tn),
                in_specs=[
                    pl.BlockSpec((1, Hp, Wp, self.c1), lambda n, j: (n, 0, 0, 0)),
                    pl.BlockSpec((K, tn), lambda n, j: (0, j)),
                    pl.BlockSpec((1, tn), lambda n, j: (0, j)),
                ],
                out_specs=pl.BlockSpec((1, Ho * Wo, tn), lambda n, j: (n, 0, j)),
            ),
            compiler_params=pltpu.CompilerParams(
                dimension_semantics=("parallel", "parallel"),
                vmem_limit_bytes=32 * 1024 * 1024,
            ),
            cost_estimate=cost,
        )(xp, self.w_folded, self.bias_padded)

        # TODO(synk): for large H*W, tile Ho with halo DMAs (manual double-buffer / pl.Element
        # index maps) instead of holding the whole padded image per grid step.
        out = out_flat[:, :, : self.c2].reshape(N, Ho, Wo, self.c2)
        return jnp.transpose(out, (0, 3, 1, 2))


# ---------------------------------------------------------------------------
# References
# ---------------------------------------------------------------------------
def _reference_f32(conv: ConvPallas, x_nchw):
    """Exact f32 Conv + BN + SiLU semantics (the PyTorch module)."""
    y = jax.lax.conv_general_dilated(
        x_nchw.astype(jnp.float32), conv.weight,
        window_strides=(conv.s, conv.s),
        padding=[(conv.p, conv.p), (conv.p, conv.p)],
        dimension_numbers=("NCHW", "OIHW", "NCHW"),
        precision=jax.lax.Precision.HIGHEST)
    scale = conv.bn_gamma / jnp.sqrt(conv.bn_var + conv.bn_eps)
    bias = conv.bn_beta - conv.bn_mean * scale
    y = y * scale[None, :, None, None] + bias[None, :, None, None]
    return y * jax.nn.sigmoid(y)


def _reference_quantized(conv: ConvPallas, x_nchw):
    """Same math as the kernel: bf16-quantized input + folded bf16 weight, f32 accumulation."""
    xq = x_nchw.astype(jnp.bfloat16).astype(jnp.float32)
    w = conv.w_folded.astype(jnp.float32)[:, : conv.c2]                       # (k*k*c1, c2)
    w_oihw = jnp.transpose(w.reshape(conv.k, conv.k, conv.c1, conv.c2), (3, 2, 0, 1))
    y = jax.lax.conv_general_dilated(
        xq, w_oihw,
        window_strides=(conv.s, conv.s),
        padding=[(conv.p, conv.p), (conv.p, conv.p)],
        dimension_numbers=("NCHW", "OIHW", "NCHW"),
        precision=jax.lax.Precision.HIGHEST)
    bias = conv.bias_padded[0, : conv.c2]
    y = y + bias[None, :, None, None]
    return y * jax.nn.sigmoid(y)


if __name__ == "__main__":
    key = jax.random.PRNGKey(0)
    kx, kp = jax.random.split(key)
    # Small shapes: batch=2, c1=4, spatial=16x16; Conv(c1=4, c2=8, k=3, s=1)
    x = jax.random.normal(kx, (2, 4, 16, 16), jnp.float32)
    conv = ConvPallas(c1=4, c2=8, k=3, s=1, key=kp)

    fwd = jax.jit(conv.__call__)
    out = jax.block_until_ready(fwd(x))
    assert out.shape == (2, 8, 16, 16), out.shape

    # Tight check: identical bf16-quantized operands, f32 accumulation (verifies kernel math).
    ref_q = jax.block_until_ready(_reference_quantized(conv, x))
    err_q = float(jnp.max(jnp.abs(out - ref_q)))
    assert err_q < 1e-3, f"mismatch vs bf16-consistent reference: {err_q}"

    # Loose check vs exact f32 module semantics (difference = bf16 operand quantization only).
    ref = jax.block_until_ready(_reference_f32(conv, x))
    err = float(jnp.max(jnp.abs(out - ref)))
    assert err < 2e-2, f"mismatch vs f32 reference: {err}"

    print("KERNEL_OK")
</pallas_src>

<mosaic_0001>
module attributes {stable_mosaic.version = 11 : i64} {
  func.func @_conv_bn_silu_kernel(%arg0: i32, %arg1: i32, %arg2: memref<1x18x18x4xbf16, #tpu.memory_space<vmem>>, %arg3: memref<36x128xbf16, #tpu.memory_space<vmem>>, %arg4: memref<1x128xf32, #tpu.memory_space<vmem>>, %arg5: memref<1x256x128xf32, #tpu.memory_space<vmem>>) attributes {dimension_semantics = [#tpu.dimension_semantics<parallel>, #tpu.dimension_semantics<parallel>], iteration_bounds = array<i64: 2, 1>, scalar_prefetch = 0 : i64, scratch_operands = 0 : i64, tpu.core_type = #tpu.core_type<tc>, window_params = [{transform_indices = @transform_0, window_bounds = array<i64: 1, 18, 18, 4>}, {transform_indices = @transform_1, window_bounds = array<i64: 36, 128>}, {transform_indices = @transform_2, window_bounds = array<i64: 1, 128>}, {transform_indices = @transform_3, window_bounds = array<i64: 1, 256, 128>}]} {
    %c0 = arith.constant 0 : index
    %c0_0 = arith.constant 0 : index
    %c0_1 = arith.constant 0 : index
    %c0_2 = arith.constant 0 : index
    %0 = vector.load %arg2[%c0, %c0_0, %c0_1, %c0_2] : memref<1x18x18x4xbf16, #tpu.memory_space<vmem>>, vector<1x18x18x4xbf16>
    %1 = vector.shape_cast %0 : vector<1x18x18x4xbf16> to vector<18x18x4xbf16>
    %2 = arith.extf %1 : vector<18x18x4xbf16> to vector<18x18x4xf32>
    %cst = arith.constant 0.000000e+00 : f32
    %3 = vector.broadcast %cst : f32 to vector<256x128xf32>
    %4 = vector.extract_strided_slice %2 {offsets = [0, 0, 0], sizes = [16, 16, 4], strides = [1, 1, 1]} : vector<18x18x4xf32> to vector<16x16x4xf32>
    %5 = vector.shape_cast %4 : vector<16x16x4xf32> to vector<256x4xf32>
    %6 = arith.truncf %5 : vector<256x4xf32> to vector<256x4xbf16>
    %c0_3 = arith.constant 0 : index
    %c0_4 = arith.constant 0 : index
    %7 = vector.load %arg3[%c0_3, %c0_4] : memref<36x128xbf16, #tpu.memory_space<vmem>>, vector<4x128xbf16>
    %cst_5 = arith.constant dense<0.000000e+00> : vector<256x128xf32>
    %8 = tpu.matmul %6, %7, %cst_5 {dimension_numbers = #tpu.dot_dimension_numbers<[1], [0], [0], [1], [0, 0, 1, 1], [], []>} : vector<256x4xbf16>, vector<4x128xbf16>, vector<256x128xf32> -> vector<256x128xf32>
    %9 = arith.addf %3, %8 : vector<256x128xf32>
    %10 = vector.extract_strided_slice %2 {offsets = [0, 1, 0], sizes = [16, 16, 4], strides = [1, 1, 1]} : vector<18x18x4xf32> to vector<16x16x4xf32>
    %11 = vector.shape_cast %10 : vector<16x16x4xf32> to vector<256x4xf32>
    %12 = arith.truncf %11 : vector<256x4xf32> to vector<256x4xbf16>
    %c4 = arith.constant 4 : index
    %c0_6 = arith.constant 0 : index
    %13 = vector.load %arg3[%c4, %c0_6] : memref<36x128xbf16, #tpu.memory_space<vmem>>, vector<4x128xbf16>
    %cst_7 = arith.constant dense<0.000000e+00> : vector<256x128xf32>
    %14 = tpu.matmul %12, %13, %cst_7 {dimension_numbers = #tpu.dot_dimension_numbers<[1], [0], [0], [1], [0, 0, 1, 1], [], []>} : vector<256x4xbf16>, vector<4x128xbf16>, vector<256x128xf32> -> vector<256x128xf32>
    %15 = arith.addf %9, %14 : vector<256x128xf32>
    %16 = vector.extract_strided_slice %2 {offsets = [0, 2, 0], sizes = [16, 16, 4], strides = [1, 1, 1]} : vector<18x18x4xf32> to vector<16x16x4xf32>
    %17 = vector.shape_cast %16 : vector<16x16x4xf32> to vector<256x4xf32>
    %18 = arith.truncf %17 : vector<256x4xf32> to vector<256x4xbf16>
    %c8 = arith.constant 8 : index
    %c0_8 = arith.constant 0 : index
    %19 = vector.load %arg3[%c8, %c0_8] : memref<36x128xbf16, #tpu.memory_space<vmem>>, vector<4x128xbf16>
    %cst_9 = arith.constant dense<0.000000e+00> : vector<256x128xf32>
    %20 = tpu.matmul %18, %19, %cst_9 {dimension_numbers = #tpu.dot_dimension_numbers<[1], [0], [0], [1], [0, 0, 1, 1], [], []>} : vector<256x4xbf16>, vector<4x128xbf16>, vector<256x128xf32> -> vector<256x128xf32>
    %21 = arith.addf %15, %20 : vector<256x128xf32>
    %22 = vector.extract_strided_slice %2 {offsets = [1, 0, 0], sizes = [16, 16, 4], strides = [1, 1, 1]} : vector<18x18x4xf32> to vector<16x16x4xf32>
    %23 = vector.shape_cast %22 : vector<16x16x4xf32> to vector<256x4xf32>
    %24 = arith.truncf %23 : vector<256x4xf32> to vector<256x4xbf16>
    %c12 = arith.constant 12 : index
    %c0_10 = arith.constant 0 : index
    %25 = vector.load %arg3[%c12, %c0_10] : memref<36x128xbf16, #tpu.memory_space<vmem>>, vector<4x128xbf16>
    %cst_11 = arith.constant dense<0.000000e+00> : vector<256x128xf32>
    %26 = tpu.matmul %24, %25, %cst_11 {dimension_numbers = #tpu.dot_dimension_numbers<[1], [0], [0], [1], [0, 0, 1, 1], [], []>} : vector<256x4xbf16>, vector<4x128xbf16>, vector<256x128xf32> -> vector<256x128xf32>
    %27 = arith.addf %21, %26 : vector<256x128xf32>
    %28 = vector.extract_strided_slice %2 {offsets = [1, 1, 0], sizes = [16, 16, 4], strides = [1, 1, 1]} : vector<18x18x4xf32> to vector<16x16x4xf32>
    %29 = vector.shape_cast %28 : vector<16x16x4xf32> to vector<256x4xf32>
    %30 = arith.truncf %29 : vector<256x4xf32> to vector<256x4xbf16>
    %c16 = arith.constant 16 : index
    %c0_12 = arith.constant 0 : index
    %31 = vector.load %arg3[%c16, %c0_12] : memref<36x128xbf16, #tpu.memory_space<vmem>>, vector<4x128xbf16>
    %cst_13 = arith.constant dense<0.000000e+00> : vector<256x128xf32>
    %32 = tpu.matmul %30, %31, %cst_13 {dimension_numbers = #tpu.dot_dimension_numbers<[1], [0], [0], [1], [0, 0, 1, 1], [], []>} : vector<256x4xbf16>, vector<4x128xbf16>, vector<256x128xf32> -> vector<256x128xf32>
    %33 = arith.addf %27, %32 : vector<256x128xf32>
    %34 = vector.extract_strided_slice %2 {offsets = [1, 2, 0], sizes = [16, 16, 4], strides = [1, 1, 1]} : vector<18x18x4xf32> to vector<16x16x4xf32>
    %35 = vector.shape_cast %34 : vector<16x16x4xf32> to vector<256x4xf32>
    %36 = arith.truncf %35 : vector<256x4xf32> to vector<256x4xbf16>
    %c20 = arith.constant 20 : index
    %c0_14 = arith.constant 0 : index
    %37 = vector.load %arg3[%c20, %c0_14] : memref<36x128xbf16, #tpu.memory_space<vmem>>, vector<4x128xbf16>
    %cst_15 = arith.constant dense<0.000000e+00> : vector<256x128xf32>
    %38 = tpu.matmul %36, %37, %cst_15 {dimension_numbers = #tpu.dot_dimension_numbers<[1], [0], [0], [1], [0, 0, 1, 1], [], []>} : vector<256x4xbf16>, vector<4x128xbf16>, vector<256x128xf32> -> vector<256x128xf32>
    %39 = arith.addf %33, %38 : vector<256x128xf32>
    %40 = vector.extract_strided_slice %2 {offsets = [2, 0, 0], sizes = [16, 16, 4], strides = [1, 1, 1]} : vector<18x18x4xf32> to vector<16x16x4xf32>
    %41 = vector.shape_cast %40 : vector<16x16x4xf32> to vector<256x4xf32>
    %42 = arith.truncf %41 : vector<256x4xf32> to vector<256x4xbf16>
    %c24 = arith.constant 24 : index
    %c0_16 = arith.constant 0 : index
    %43 = vector.load %arg3[%c24, %c0_16] : memref<36x128xbf16, #tpu.memory_space<vmem>>, vector<4x128xbf16>
    %cst_17 = arith.constant dense<0.000000e+00> : vector<256x128xf32>
    %44 = tpu.matmul %42, %43, %cst_17 {dimension_numbers = #tpu.dot_dimension_numbers<[1], [0], [0], [1], [0, 0, 1, 1], [], []>} : vector<256x4xbf16>, vector<4x128xbf16>, vector<256x128xf32> -> vector<256x128xf32>
    %45 = arith.addf %39, %44 : vector<256x128xf32>
    %46 = vector.extract_strided_slice %2 {offsets = [2, 1, 0], sizes = [16, 16, 4], strides = [1, 1, 1]} : vector<18x18x4xf32> to vector<16x16x4xf32>
    %47 = vector.shape_cast %46 : vector<16x16x4xf32> to vector<256x4xf32>
    %48 = arith.truncf %47 : vector<256x4xf32> to vector<256x4xbf16>
    %c28 = arith.constant 28 : index
    %c0_18 = arith.constant 0 : index
    %49 = vector.load %arg3[%c28, %c0_18] : memref<36x128xbf16, #tpu.memory_space<vmem>>, vector<4x128xbf16>
    %cst_19 = arith.constant dense<0.000000e+00> : vector<256x128xf32>
    %50 = tpu.matmul %48, %49, %cst_19 {dimension_numbers = #tpu.dot_dimension_numbers<[1], [0], [0], [1], [0, 0, 1, 1], [], []>} : vector<256x4xbf16>, vector<4x128xbf16>, vector<256x128xf32> -> vector<256x128xf32>
    %51 = arith.addf %45, %50 : vector<256x128xf32>
    %52 = vector.extract_strided_slice %2 {offsets = [2, 2, 0], sizes = [16, 16, 4], strides = [1, 1, 1]} : vector<18x18x4xf32> to vector<16x16x4xf32>
    %53 = vector.shape_cast %52 : vector<16x16x4xf32> to vector<256x4xf32>
    %54 = arith.truncf %53 : vector<256x4xf32> to vector<256x4xbf16>
    %c32 = arith.constant 32 : index
    %c0_20 = arith.constant 0 : index
    %55 = vector.load %arg3[%c32, %c0_20] : memref<36x128xbf16, #tpu.memory_space<vmem>>, vector<4x128xbf16>
    %cst_21 = arith.constant dense<0.000000e+00> : vector<256x128xf32>
    %56 = tpu.matmul %54, %55, %cst_21 {dimension_numbers = #tpu.dot_dimension_numbers<[1], [0], [0], [1], [0, 0, 1, 1], [], []>} : vector<256x4xbf16>, vector<4x128xbf16>, vector<256x128xf32> -> vector<256x128xf32>
    %57 = arith.addf %51, %56 : vector<256x128xf32>
    %c0_22 = arith.constant 0 : index
    %c0_23 = arith.constant 0 : index
    %58 = vector.load %arg4[%c0_22, %c0_23] : memref<1x128xf32, #tpu.memory_space<vmem>>, vector<1x128xf32>
    %59 = vector.broadcast %58 : vector<1x128xf32> to vector<256x128xf32>
    %60 = arith.addf %57, %59 : vector<256x128xf32>
    %61 = arith.negf %60 : vector<256x128xf32>
    %62 = math.exp %61 : vector<256x128xf32>
    %cst_24 = arith.constant 1.000000e+00 : f32
    %63 = vector.broadcast %cst_24 : f32 to vector<256x128xf32>
    %64 = arith.addf %63, %62 : vector<256x128xf32>
    %65 = arith.divf %63, %64 : vector<256x128xf32>
    %66 = arith.mulf %60, %65 : vector<256x128xf32>
    %c0_25 = arith.constant 0 : index
    %c0_26 = arith.constant 0 : index
    %c0_27 = arith.constant 0 : index
    %67 = vector.load %arg5[%c0_25, %c0_26, %c0_27] : memref<1x256x128xf32, #tpu.memory_space<vmem>>, vector<1x256x128xf32>
    %68 = vector.shape_cast %67 : vector<1x256x128xf32> to vector<256x128xf32>
    %69 = vector.shape_cast %66 : vector<256x128xf32> to vector<1x256x128xf32>
    tpu.vector_store %arg5[%c0_25, %c0_26, %c0_27], %69 {strides = array<i32>} : memref<1x256x128xf32, #tpu.memory_space<vmem>>, vector<1x256x128xf32>,
    return
  }
  func.func @transform_0(%arg0: i32, %arg1: i32) -> (i32, i32, i32, i32) {
    %c0_i32 = arith.constant 0 : i32
    %c0_i32_0 = arith.constant 0 : i32
    %c0_i32_1 = arith.constant 0 : i32
    %c0_i32_2 = arith.constant 0 : i32
    return %arg0, %c0_i32, %c0_i32_0, %c0_i32_1 : i32, i32, i32, i32
  }
  func.func @transform_1(%arg0: i32, %arg1: i32) -> (i32, i32) {
    %c0_i32 = arith.constant 0 : i32
    %c0_i32_0 = arith.constant 0 : i32
    return %c0_i32, %arg1 : i32, i32
  }
  func.func @transform_2(%arg0: i32, %arg1: i32) -> (i32, i32) {
    %c0_i32 = arith.constant 0 : i32
    %c0_i32_0 = arith.constant 0 : i32
    return %c0_i32, %arg1 : i32, i32
  }
  func.func @transform_3(%arg0: i32, %arg1: i32) -> (i32, i32, i32) {
    %c0_i32 = arith.constant 0 : i32
    %c0_i32_0 = arith.constant 0 : i32
    return %arg0, %c0_i32, %arg1 : i32, i32, i32
  }
}

</mosaic_0001>

<bundles_post_ra>
// kernel: a_call__.1
= control target key start
LH: loop header
LB: loop body
LE: loop exit
PB: predicated region body
PF: predicated region fallthrough
CT: control target
= control target key end

     0   :  { %s4158_s12 = smov 0   ;;  %s4160_s13 = smov 0   ;;  %s5265_s0 = inlined_call_operand.vmem [shape: bf16[2,18,18,4], index: 0, kind: input, shape index: {}]   ;;  %s5266_s1 = inlined_call_operand.vmem [shape: bf16[36,128], index: 1, kind: input, shape index: {}]   ;;  %s5267_s2 = inlined_call_operand.vmem [shape: f32[1,128], index: 2, kind: input, shape index: {}]   ;;  %s5268_s3 = inlined_call_operand.vmem [shape: f32[2,256,128], index: 3, kind: output, shape index: {}]  }
   0x1   :  { %s4162_s14 = smov 0  }
   0x2 LB: > { %s25_s15 = sadd.s32 1, %s4132_s13  ;;  %p2988_p0 = scmp.ge.s32.totalorder %s4136_s14, 1  ;;  %s4136_s14 = sphi %s4162_s14, %s13_s14   ;;  %s4132_s13 = sphi %s4160_s13, %s5353_s13   ;;  %s4128_s12 = sphi %s4158_s12, %s5352_s12  }
   0x3   : > { %p27_p1 = scmp.ge.s32.totalorder %s25_s15, 2  ;;  %p168_p2 = scmp.lt.s32.totalorder %s4136_s14, 3 }
   0x5   : > { %s5355_s15 = smov (%p27_p1, %s25_s15), 0  ;;  %p169_p3 = pnand %p2988_p0, %p168_p2 }
   0x7   : > { %172 = sbr.rel (%p169_p3) target bundleno = 564 (0x234), region = 32 }
   0xe   : > { %v3946_v0 = vld [vmem:[%s5266_s1] ss:$0 sps:$4 sm:$0xcc]   ;;  %vm579_vm0 = vcmask 1041408   ;;  %v4182_v1 = vld [vmem:[%s5266_s1 + $0x8] sm:$0x3] }
   0xf   : > { %p202_p4 = scmp.lt.s32.totalorder %s4128_s12, 1  ;;  %v529_v2 = vrot.slane %v3946_v0, 2  ;;  %3915 = vmatprep.subr.msk.bf16.mxu0 %vm579_vm0, %v4182_v1  ;;  %v4188_v3 = vsel %vm579_vm0, %v4182_v1, 0  ;;  %v347_v4 = vld [vmem:[%s5266_s1] sm:$0x3]  ;;  %vm396_vm1 = vcmask 1046528  }
  0x10   : > { %5307 = vst [vmem:[#allocation2_spill] sm:$0xff] %v4188_v3  ;;  %3484 = vmatpush3.bf16.msra.mxu0 %v4188_v3  ;;  %v3948_v5 = vld [vmem:[%s5266_s1 + $0x8] ss:$0 sps:$4 sm:$0xcc]   ;;  %vm530_vm2 = vcmask 31744   ;;  %v793_v39 = vsel %vm579_vm0, %v347_v4, 0 }
  0x11   : > { %s5357_s12 = smov (!%p202_p4, %s4128_s12), 1  ;;  %3911 = vmatprep.subr.msk.bf16.mxu1 %vm579_vm0, %v529_v2  ;;  %v581_v6 = vsel %vm579_vm0, %v529_v2, 0  ;;  %v1758_v7 = vrot.slane %v3948_v5, 2  ;;  %v4278_v46 = vld [vmem:[%s5266_s1 + $0x4] sm:$0x3]  ;;  %vm956_vm3 = vcmask 1045504  }
  0x12   : > { %3348 = vmatpush3.bf16.msra.mxu1 %v581_v6  ;;  %s3921_s24 = smul.u32 216, %s5357_s12  ;;  %v4322_v5 = vld [vmem:[%s5266_s1 + $0xc] sm:$0x3]  ;;  %s3193_s17 = sshll.u32 %s5357_s12, 8 }
  0x13   : > { %3912 = vmatprep.subr.msk.bf16.mxu1 %vm579_vm0, %v347_v4  ;;  %3917 = vmatprep.subr.msk.bf16.mxu0 %vm579_vm0, %v1758_v7  ;;  %v1763_v45 = vsel %vm579_vm0, %v1758_v7, 0  ;;  %s5120_s19 = scalar_lea.vmem %s5268_s3, %s3193_s17 }
  0x14   : > { %s4206_s27 = scalar_lea.vmem %s5265_s0, %s3921_s24 }
  0x15   : > { %v4210_v8 = vld [vmem:[%s4206_s27] sm:$0xff]   ;;  %v4213_v9 = vld [vmem:[%s4206_s27 + $0x8] sm:$0x1]  ;;  %v4216_v10 = vld [vmem:[%s4206_s27 + $0xc] sm:$0xff]  }
  0x16   : > { %v5271_v11 = vunpack.c.l.bf16 %v4210_v8  ;;  %v5270_v12 = vunpack.c.h.bf16 %v4210_v8  ;;  %v5269_v13 = vunpack.c.l.bf16 %v4213_v9  ;;  %v4222_v14 = vld [vmem:[%s4206_s27 + $0x14] sm:$0x1]  ;;  %v280_v15 = vunpack.c.l.bf16 %v4216_v10  ;;  %v4226_v16 = vld [vmem:[%s4206_s27 + $0x18] sm:$0xff]   ;;  %v4242_v25 = vld [vmem:[%s4206_s27 + $0x20] sm:$0x1] }
  0x17   : > { %v281_v17 = vunpack.c.h.bf16 %v4216_v10  ;;  %v282_v18 = vunpack.c.l.bf16 %v4222_v14  ;;  %v283_v22 = vunpack.c.l.bf16 %v4226_v16  ;;  %v4249_v29 = vld [vmem:[%s4206_s27 + $0x24] sm:$0xff]   ;;  %v284_v33 = vunpack.c.h.bf16 %v4226_v16  ;;  %v4258_v36 = vld [vmem:[%s4206_s27 + $0x2c] sm:$0x1]  ;;  %v4261_v37 = vld [vmem:[%s4206_s27 + $0x30] sm:$0xff]  }
  0x18   : > { %v397_v19 = vrot.slane %v5271_v11, 1  ;;  %v398_v20 = vrot.slane %v5270_v12, 1  ;;  %v400_v21 = vrot.slane %v5269_v13, 1  ;;  %v402_v23 = vrot.slane %v280_v15, 1  ;;  %v4268_v42 = vld [vmem:[%s4206_s27 + $0x38] sm:$0x1] }
  0x19   : > { %v403_v24 = vrot.slane %v281_v17, 1  ;;  %v405_v28 = vrot.slane %v282_v18, 1  ;;  %v285_v34 = vunpack.c.l.bf16 %v4242_v25  ;;  %v407_v35 = vrot.slane %v283_v22, 1  ;;  %v4289_v51 = vld [vmem:[%s4206_s27 + $0x3c] sm:$0xff]   ;;  %v4296_v56 = vld [vmem:[%s4206_s27 + $0x44] sm:$0x1] }
  0x1a   : > { %v399_v26 = vsel %vm396_vm1, %v397_v19, %v398_v20  ;;  %v401_v27 = vsel %vm396_vm1, %v398_v20, %v400_v21  ;;  %v286_v40 = vunpack.c.l.bf16 %v4249_v29  ;;  %v287_v41 = vunpack.c.h.bf16 %v4249_v29  ;;  %v4299_v57 = vld [vmem:[%s4206_s27 + $0x48] sm:$0xff]   ;;  %v4317_v4 = vld [vmem:[%s4206_s27 + $0x50] sm:$0x1]  ;;  %v4333_v21 = vld [vmem:[%s4206_s27 + $0x54] sm:$0xff]  }
  0x1b   : > { %v509_v30 = vpack.c.bf16 %v401_v27, %v399_v26  ;;  %v404_v31 = vsel %vm396_vm1, %v402_v23, %v403_v24  ;;  %v406_v32 = vsel %vm396_vm1, %v403_v24, %v405_v28  ;;  %v408_v43 = vrot.slane %v284_v33, 1  ;;  %v4342_v28 = vld [vmem:[%s4206_s27 + $0x5c] sm:$0x1] }
  0x1c   : > { %v510_v38 = vpack.c.bf16 %v406_v32, %v404_v31  ;;  %v410_v44 = vrot.slane %v285_v34, 1  ;;  %v288_v47 = vunpack.c.l.bf16 %v4258_v36  ;;  %v412_v48 = vrot.slane %v286_v40, 1 }
  0x1d   : > { %3349 = vmatprep.mubr.msk.bf16.mxu1 %vm530_vm2, %v509_v30  ;;  %v413_v49 = vrot.slane %v287_v41, 1  ;;  %v289_v50 = vunpack.c.l.bf16 %v4261_v37  ;;  %v409_v52 = vsel %vm396_vm1, %v407_v35, %v408_v43  ;;  %v290_v54 = vunpack.c.h.bf16 %v4261_v37 }
  0x1e   : > { %3485 = vmatprep.mubr.msk.bf16.mxu0 %vm530_vm2, %v510_v38  ;;  %3350 = vmatmul.mubr.msk.bf16.vlgmr.msra.gmra.mrb[0].mxu1 %vm530_vm2, %v510_v38  ;;  %v411_v53 = vsel %vm396_vm1, %v408_v43, %v410_v44  ;;  %v291_v55 = vunpack.c.l.bf16 %v4268_v42  ;;  %v415_v60 = vrot.slane %v288_v47, 1  ;;  %v292_v0 = vunpack.c.l.bf16 %v4289_v51 }
  0x1f   : > { %3382 = vmatpush3.bf16.msra.mxu1 %v793_v39  ;;  %v4301_v58 = vpack.c.bf16 %v411_v53, %v409_v52  ;;  %v414_v59 = vsel %vm396_vm1, %v412_v48, %v413_v49  ;;  %v417_v61 = vrot.slane %v289_v50, 1  ;;  %v418_v62 = vrot.slane %v290_v54, 1  ;;  %v4369_v53 = vld [vmem:[%s4206_s27 + $0x60] sm:$0xff]  }
  0x20   : > { %3913 = vmatprep.subr.msk.bf16.mxu1 %vm579_vm0, %v4278_v46  ;;  %v420_v63 = vrot.slane %v291_v55, 1  ;;  %v293_v2 = vunpack.c.h.bf16 %v4289_v51  ;;  %v416_v6 = vsel %vm396_vm1, %v413_v49, %v415_v60  ;;  %v5287_v7 = vunpack.c.l.bf16 %v4296_v56  ;;  %v4376_v60 = vld [vmem:[%s4206_s27 + $0x68] sm:$0x1] }
  0x21   : > { %3486 = vmatmul.mubr.msk.bf16.vlgmr.msra.gmra.mrb[0].mxu0 %vm530_vm2, %v4301_v58  ;;  %3353 = vmatprep.mubr.msk.bf16.mxu1 %vm530_vm2, %v4301_v58  ;;  %v5286_v19 = vunpack.c.l.bf16 %v4299_v57  ;;  %v5281_v20 = vunpack.c.h.bf16 %v4299_v57  ;;  %v4335_v23 = vpack.c.bf16 %v416_v6, %v414_v59  ;;  %v419_v24 = vsel %vm396_vm1, %v417_v61, %v418_v62 }
  0x22   : > { %3518 = vmatpush3.bf16.msra.mxu0 %v1763_v45  ;;  %v421_v26 = vsel %vm396_vm1, %v418_v62, %v420_v63  ;;  %v422_v27 = vrot.slane %v292_v0, 1  ;;  %v423_v31 = vrot.slane %v293_v2, 1  ;;  %v425_v32 = vrot.slane %v5287_v7, 1 }
  0x23   : > { %v4344_v30 = vpack.c.bf16 %v421_v26, %v419_v24  ;;  %v5278_v35 = vunpack.c.l.bf16 %v4317_v4  ;;  %3918 = vmatprep.subr.msk.bf16.mxu0 %vm579_vm0, %v4322_v5  ;;  %3489 = vmatprep.mubr.msk.bf16.mxu0 %vm530_vm2, %v4335_v23  ;;  %v427_v38 = vrot.slane %v5286_v19, 1  ;;  %v428_v39 = vrot.slane %v5281_v20, 1 }
  0x24   : > { %v5277_v43 = vunpack.c.l.bf16 %v4333_v21  ;;  %v5276_v44 = vunpack.c.h.bf16 %v4333_v21  ;;  %v424_v45 = vsel %vm396_vm1, %v422_v27, %v423_v31  ;;  %v426_v48 = vsel %vm396_vm1, %v423_v31, %v425_v32  ;;  %v4394_v32 = vld [vmem:[%s4206_s27 + $0x6c] sm:$0xff]  }
  0x25   : > { %v430_v49 = vrot.slane %v5278_v35, 1  ;;  %v5272_v52 = vunpack.c.l.bf16 %v4342_v28  ;;  %v4373_v59 = vpack.c.bf16 %v426_v48, %v424_v45  ;;  %v5275_v6 = vunpack.c.l.bf16 %v4369_v53 }
  0x26   : > { %3354 = vmatmul.mubr.msk.bf16.gmra.mrb[4].mxu1 %vm530_vm2, %v4335_v23  ;;  %v432_v61 = vrot.slane %v5277_v43, 1  ;;  %v433_v62 = vrot.slane %v5276_v44, 1  ;;  %v429_v24 = vsel %vm396_vm1, %v427_v38, %v428_v39  ;;  %v5274_v27 = vunpack.c.h.bf16 %v4369_v53  ;;  %v4401_v38 = vld [vmem:[%s4206_s27 + $0x74] sm:$0x1] }
  0x27   : > { %3357 = vmatprep.mubr.msk.bf16.mxu1 %vm530_vm2, %v4344_v30  ;;  %v435_v63 = vrot.slane %v5272_v52, 1  ;;  %v431_v26 = vsel %vm396_vm1, %v428_v39, %v430_v49  ;;  %v5273_v31 = vunpack.c.l.bf16 %v4376_v60  ;;  %v962_v45 = vrot.slane %v280_v15, 2  ;;  %v4412_v52 = vld [vmem:[%s4206_s27 + $0x78] sm:$0xff]   ;;  %v4415_v15 = vld [vmem:[%s4206_s27 + $0x80] sm:$0x1] }
  0x28   : > { %v434_v48 = vsel %vm396_vm1, %v432_v61, %v433_v62  ;;  %v963_v39 = vrot.slane %v281_v17, 2  ;;  %v965_v49 = vrot.slane %v282_v18, 2  ;;  %v4407_v12 = vpack.c.bf16 %v431_v26, %v429_v24 }
  0x29   : > { %3490 = vmatmul.mubr.msk.bf16.gmra.mrb[4].mxu0 %vm530_vm2, %v4344_v30  ;;  %v436_v13 = vsel %vm396_vm1, %v433_v62, %v435_v63  ;;  %v437_v11 = vrot.slane %v5275_v6, 1  ;;  %v438_v61 = vrot.slane %v5274_v27, 1  ;;  %v440_v17 = vrot.slane %v5273_v31, 1 }
  0x2a   : > { %3493 = vmatprep.mubr.msk.bf16.mxu0 %vm530_vm2, %v4373_v59  ;;  %v5280_v14 = vunpack.c.l.bf16 %v4394_v32  ;;  %v5279_v18 = vunpack.c.h.bf16 %v4394_v32  ;;  %v4427_v62 = vpack.c.bf16 %v436_v13, %v434_v48  ;;  %v5285_v63 = vunpack.c.l.bf16 %v4401_v38 }
  0x2b   : > { %v967_v24 = vrot.slane %v283_v22, 2  ;;  %v5283_v26 = vunpack.c.l.bf16 %v4412_v52  ;;  %v5282_v31 = vunpack.c.h.bf16 %v4412_v52  ;;  %v5284_v27 = vunpack.c.l.bf16 %v4415_v15 }
  0x2c   : > { %v968_v6 = vrot.slane %v284_v33, 2  ;;  %v970_v44 = vrot.slane %v285_v34, 2  ;;  %v964_v13 = vsel %vm956_vm3, %v962_v45, %v963_v39  ;;  %v966_v48 = vsel %vm956_vm3, %v963_v39, %v965_v49  ;;  %v4450_v33 = vld [vmem:[%s4206_s27 + $0x84] sm:$0xff]   ;;  %v4453_v34 = vld [vmem:[%s4206_s27 + $0x8c] sm:$0x1] }
  0x2d   : > { %v439_v22 = vsel %vm396_vm1, %v437_v11, %v438_v61  ;;  %v441_v43 = vsel %vm396_vm1, %v438_v61, %v440_v17  ;;  %v442_v35 = vrot.slane %v5280_v14, 1  ;;  %v443_v25 = vrot.slane %v5279_v18, 1  ;;  %v4468_v17 = vld [vmem:[%s4206_s27 + $0x90] sm:$0xff]  }
  0x2e   : > { %3358 = vmatmul.mubr.msk.bf16.gmra.mrb[8].mxu1 %vm530_vm2, %v4373_v59  ;;  %v445_v45 = vrot.slane %v5285_v63, 1  ;;  %v4459_v11 = vpack.c.bf16 %v966_v48, %v964_v13  ;;  %v447_v39 = vrot.slane %v5283_v26, 1  ;;  %v448_v49 = vrot.slane %v5282_v31, 1  ;;  %v4476_v48 = vld [vmem:[%s4206_s27 + $0x98] sm:$0x1] }
  0x2f   : > { %3361 = vmatprep.mubr.msk.bf16.mxu1 %vm530_vm2, %v4407_v12  ;;  %v450_v61 = vrot.slane %v5284_v27, 1  ;;  %v4470_v18 = vpack.c.bf16 %v441_v43, %v439_v22  ;;  %v5293_v14 = vunpack.c.l.bf16 %v4450_v33  ;;  %v5292_v20 = vunpack.c.h.bf16 %v4450_v33 }
  0x30   : > { %v5290_v13 = vunpack.c.l.bf16 %v4453_v34  ;;  %v444_v31 = vsel %vm396_vm1, %v442_v35, %v443_v25  ;;  %v969_v26 = vsel %vm956_vm3, %v967_v24, %v968_v6  ;;  %v971_v27 = vsel %vm956_vm3, %v968_v6, %v970_v44 }
  0x31   : > { %3494 = vmatmul.mubr.msk.bf16.gmra.mrb[8].mxu0 %vm530_vm2, %v4407_v12  ;;  %v972_v43 = vrot.slane %v286_v40, 2  ;;  %v446_v22 = vsel %vm396_vm1, %v443_v25, %v445_v45  ;;  %v973_v63 = vrot.slane %v287_v41, 2  ;;  %v5289_v19 = vunpack.c.l.bf16 %v4468_v17 }
  0x32   : > { %3497 = vmatprep.mubr.msk.bf16.mxu0 %vm530_vm2, %v4427_v62  ;;  %v5288_v7 = vunpack.c.h.bf16 %v4468_v17  ;;  %v449_v35 = vsel %vm396_vm1, %v447_v39, %v448_v49  ;;  %v451_v44 = vsel %vm396_vm1, %v448_v49, %v450_v61  ;;  %v975_v40 = vrot.slane %v288_v47, 2 }
  0x33   : > { %v5291_v6 = vunpack.c.l.bf16 %v4476_v48  ;;  %v452_v24 = vrot.slane %v5293_v14, 1  ;;  %v453_v41 = vrot.slane %v5292_v20, 1  ;;  %v455_v25 = vrot.slane %v5290_v13, 1 }
  0x34   : > { %v4505_v45 = vpack.c.bf16 %v446_v22, %v444_v31  ;;  %v4507_v39 = vpack.c.bf16 %v971_v27, %v969_v26  ;;  %v1964_v36 = vsel %vm579_vm0, %v4322_v5, 0  ;;  %v4513_v47 = vpack.c.bf16 %v451_v44, %v449_v35  ;;  %v4521_v27 = vld [vmem:[%s4206_s27 + $0x9c] sm:$0xff]   ;;  %v4526_v5 = vld [vmem:[%s5266_s1 + $0xc] ss:$0 sps:$4 sm:$0xcc]  }
  0x35   : > { %v974_v49 = vsel %vm956_vm3, %v972_v43, %v973_v63  ;;  %v457_v61 = vrot.slane %v5289_v19, 1  ;;  %v458_v31 = vrot.slane %v5288_v7, 1  ;;  %v976_v26 = vsel %vm956_vm3, %v973_v63, %v975_v40  ;;  %v4536_v44 = vld [vmem:[%s4206_s27 + $0xa4] sm:$0x1]  ;;  %v4545_v40 = vld [vmem:[%s4206_s27 + $0xa8] sm:$0xff]  }
  0x36   : > { %3362 = vmatmul.mubr.msk.bf16.gmra.mrb[12].mxu1 %vm530_vm2, %v4427_v62  ;;  %v977_v22 = vrot.slane %v289_v50, 2  ;;  %v978_v43 = vrot.slane %v290_v54, 2  ;;  %v460_v35 = vrot.slane %v5291_v6, 1  ;;  %v454_v7 = vsel %vm396_vm1, %v452_v24, %v453_v41  ;;  %v4548_v50 = vld [vmem:[%s4206_s27 + $0xb0] sm:$0x1] }
  0x37   : > { %3365 = vmatprep.mubr.msk.bf16.mxu1 %vm530_vm2, %v4470_v18  ;;  %v456_v19 = vsel %vm396_vm1, %v453_v41, %v455_v25  ;;  %v980_v13 = vrot.slane %v291_v55, 2  ;;  %v982_v63 = vrot.slane %v292_v0, 2  ;;  %v983_v54 = vrot.slane %v293_v2, 2 }
  0x38   : > { %v5308_v24 = vunpack.c.l.bf16 %v4296_v56  ;;  %v5298_v41 = vunpack.c.l.bf16 %v4521_v27  ;;  %v4560_v55 = vpack.c.bf16 %v976_v26, %v974_v49  ;;  %v459_v0 = vsel %vm396_vm1, %v457_v61, %v458_v31 }
  0x39   : > { %3498 = vmatmul.mubr.msk.bf16.gmra.mrb[12].mxu0 %vm530_vm2, %v4470_v18  ;;  %v5296_v25 = vunpack.c.l.bf16 %v4536_v44  ;;  %v461_v2 = vsel %vm396_vm1, %v458_v31, %v460_v35  ;;  %v5294_v56 = vunpack.c.l.bf16 %v4545_v40  ;;  %v5297_v14 = vunpack.c.l.bf16 %v4548_v50 }
  0x3a   : > { %3519 = vmatprep.mubr.msk.bf16.mxu0 %vm530_vm2, %v4459_v11  ;;  %v985_v6 = vrot.slane %v5308_v24, 2  ;;  %v5295_v24 = vunpack.c.h.bf16 %v4545_v40  ;;  %v4569_v42 = vpack.c.bf16 %v456_v19, %v454_v7  ;;  %v979_v49 = vsel %vm956_vm3, %v977_v22, %v978_v43 }
  0x3b   : > { %v981_v61 = vsel %vm956_vm3, %v978_v43, %v980_v13  ;;  %v984_v26 = vsel %vm956_vm3, %v982_v63, %v983_v54  ;;  %v462_v35 = vrot.slane %v5298_v41, 1  ;;  %v5310_v20 = vunpack.c.h.bf16 %v4521_v27  ;;  %v4599_v63 = vld [vmem:[%s4206_s27 + $0xbc] sm:$0x1] }
  0x3c   : > { %5309 = vst [vmem:[#allocation3_spill] sm:$0xff] %v4569_v42  ;;  %v986_v31 = vsel %vm956_vm3, %v983_v54, %v985_v6  ;;  %v4583_v19 = vpack.c.bf16 %v461_v2, %v459_v0  ;;  %v465_v13 = vrot.slane %v5296_v25, 1  ;;  %v4587_v22 = vpack.c.bf16 %v981_v61, %v979_v49 }
  0x3d   : > { %v463_v7 = vrot.slane %v5310_v20, 1  ;;  %v467_v6 = vrot.slane %v5294_v56, 1  ;;  %v468_v43 = vrot.slane %v5295_v24, 1  ;;  %v470_v20 = vrot.slane %v5297_v14, 1 }
  0x3e   : > { %3366 = vmatmul.mubr.msk.bf16.gmra.mrb[16].mxu1 %vm530_vm2, %v4505_v45  ;;  %v5311_v54 = vrot.slane %v4526_v5, 2  ;;  %v4604_v0 = vpack.c.bf16 %v986_v31, %v984_v26  ;;  %v5312_v2 = vunpack.c.l.bf16 %v4299_v57  ;;  %v5313_v61 = vunpack.c.h.bf16 %v4299_v57 }
  0x3f   : > { %3369 = vmatprep.mubr.msk.bf16.mxu1 %vm530_vm2, %v4513_v47  ;;  %v5314_v24 = vunpack.c.l.bf16 %v4317_v4  ;;  %v464_v14 = vsel %vm396_vm1, %v462_v35, %v463_v7  ;;  %v5315_v41 = vunpack.c.l.bf16 %v4333_v21  ;;  %v5316_v26 = vunpack.c.h.bf16 %v4333_v21 }
  0x40   : > { %v987_v49 = vrot.slane %v5312_v2, 2  ;;  %v988_v56 = vrot.slane %v5313_v61, 2  ;;  %v466_v4 = vsel %vm396_vm1, %v463_v7, %v465_v13 }
  0x41   : > { %3520 = vmatmul.mubr.msk.bf16.vlgmr.msra.gmra.mrb[0].mxu0 %vm530_vm2, %v4507_v39  ;;  %v990_v25 = vrot.slane %v5314_v24, 2  ;;  %v992_v3 = vrot.slane %v5315_v41, 2  ;;  %v993_v31 = vrot.slane %v5316_v26, 2  ;;  %v471_v41 = vsel %vm396_vm1, %v468_v43, %v470_v20 }
  0x42   : > { %3552 = vmatpush3.bf16.msra.mxu0 %v1964_v36  ;;  %3523 = vmatprep.mubr.msk.bf16.mxu0 %vm530_vm2, %v4560_v55  ;;  %v4596_v36 = vld [vmem:[%s4206_s27 + $0xb4] sm:$0xff]   ;;  %v989_v26 = vsel %vm956_vm3, %v987_v49, %v988_v56 }
  0x43   : > { %3919 = vmatprep.subr.msk.bf16.mxu0 %vm579_vm0, %v5311_v54  ;;  %v5317_v54 = vunpack.c.l.bf16 %v4342_v28  ;;  %v5303_v24 = vunpack.c.l.bf16 %v4596_v36  ;;  %v5302_v61 = vunpack.c.h.bf16 %v4596_v36  ;;  %v4632_v28 = vpack.c.bf16 %v466_v4, %v464_v14 }
  0x44   : > { %v994_v7 = vsel %vm956_vm3, %v992_v3, %v993_v31  ;;  %v5319_v14 = vunpack.c.l.bf16 %v4599_v63 }
  0x45   : > { %v995_v2 = vrot.slane %v5317_v54, 2  ;;  %v991_v54 = vsel %vm956_vm3, %v988_v56, %v990_v25  ;;  %v5320_v56 = vunpack.c.l.bf16 %v4369_v53 }
  0x46   : > { %3370 = vmatmul.mubr.msk.bf16.gmra.mrb[20].mxu1 %vm530_vm2, %v4569_v42  ;;  %v469_v42 = vsel %vm396_vm1, %v467_v6, %v468_v43  ;;  %v472_v6 = vrot.slane %v5303_v24, 1  ;;  %v473_v43 = vrot.slane %v5302_v61, 1  ;;  %v475_v20 = vrot.slane %v5319_v14, 1 }
  0x47   : > { %3373 = vmatprep.mubr.msk.bf16.mxu1 %vm530_vm2, %v4583_v19  ;;  %v996_v13 = vsel %vm956_vm3, %v993_v31, %v995_v2  ;;  %v4639_v35 = vpack.c.bf16 %v471_v41, %v469_v42  ;;  %v4649_v3 = vpack.c.bf16 %v991_v54, %v989_v26  ;;  %v997_v42 = vrot.slane %v5320_v56, 2 }
  0x48   : > { %v4651_v25 = vpack.c.bf16 %v996_v13, %v994_v7  ;;  %v474_v49 = vsel %vm396_vm1, %v472_v6, %v473_v43  ;;  %v476_v31 = vsel %vm396_vm1, %v473_v43, %v475_v20  ;;  %v5321_v2 = vunpack.c.h.bf16 %v4369_v53 }
  0x49   : > { %3524 = vmatmul.mubr.msk.bf16.gmra.mrb[4].mxu0 %vm530_vm2, %v4587_v22  ;;  %5318 = vst [vmem:[#allocation4_spill] sm:$0xff] %v4639_v35  ;;  %v5322_v41 = vunpack.c.l.bf16 %v4376_v60  ;;  %v5323_v26 = vunpack.c.l.bf16 %v4394_v32  ;;  %v5324_v7 = vunpack.c.h.bf16 %v4394_v32  ;;  %v5325_v56 = vunpack.c.l.bf16 %v4401_v38 }
  0x4a   : > { %3527 = vmatprep.mubr.msk.bf16.mxu0 %vm530_vm2, %v4604_v0  ;;  %v998_v4 = vrot.slane %v5321_v2, 2  ;;  %v5326_v24 = vunpack.c.l.bf16 %v4210_v8  ;;  %v5327_v43 = vunpack.c.h.bf16 %v4210_v8  ;;  %v5328_v2 = vunpack.c.l.bf16 %v4213_v9 }
  0x4b   : > { %v1000_v14 = vrot.slane %v5322_v41, 2  ;;  %v1002_v54 = vrot.slane %v5323_v26, 2  ;;  %v1003_v13 = vrot.slane %v5324_v7, 2  ;;  %v1005_v61 = vrot.slane %v5325_v56, 2 }
  0x4c   : > { %v957_v6 = vrot.slane %v5326_v24, 2  ;;  %v958_v20 = vrot.slane %v5327_v43, 2  ;;  %v4677_v60 = vpack.c.bf16 %v476_v31, %v474_v49  ;;  %v999_v38 = vsel %vm956_vm3, %v997_v42, %v998_v4 }
  0x4d   : > { %v1001_v41 = vsel %vm956_vm3, %v998_v4, %v1000_v14  ;;  %v1004_v24 = vsel %vm956_vm3, %v1002_v54, %v1003_v13  ;;  %v1006_v26 = vsel %vm956_vm3, %v1003_v13, %v1005_v61  ;;  %v5329_v7 = vunpack.c.l.bf16 %v4412_v52 }
  0x4e   : > { %3374 = vmatmul.mubr.msk.bf16.gmra.mrb[24].mxu1 %vm530_vm2, %v4632_v28  ;;  %v4687_v9 = vpack.c.bf16 %v1001_v41, %v999_v38  ;;  %v4692_v31 = vsel %vm956_vm3, %v957_v6, %v958_v20  ;;  %v4699_v42 = vpack.c.bf16 %v1006_v26, %v1004_v24  ;;  %v5330_v61 = vunpack.c.h.bf16 %v4412_v52  ;;  %v4716_v38 = vld [vmem:[%s5266_s1 + $0x4] ss:$0 sps:$4 sm:$0xcc]  }
  0x4f   : > { %3377 = vmatprep.mubr.msk.bf16.mxu1 %vm530_vm2, %v4639_v35  ;;  %v960_v35 = vrot.slane %v5328_v2, 2  ;;  %v1007_v49 = vrot.slane %v5329_v7, 2  ;;  %v5331_v14 = vunpack.c.l.bf16 %v4415_v15  ;;  %v5332_v6 = vunpack.c.l.bf16 %v4450_v33 }
  0x50   : > { %v1008_v4 = vrot.slane %v5330_v61, 2  ;;  %v5334_v2 = vunpack.c.l.bf16 %v4453_v34  ;;  %v1135_v24 = vsel %vm579_vm0, %v4278_v46, 0  ;;  %v5306_v7 = vrot.slane %v4716_v38, 2 }
  0x51   : > { %3528 = vmatmul.mubr.msk.bf16.gmra.mrb[8].mxu0 %vm530_vm2, %v4649_v3  ;;  %v4695_v56 = vsel %vm956_vm3, %v958_v20, %v960_v35  ;;  %v1010_v54 = vrot.slane %v5331_v14, 2  ;;  %v1012_v43 = vrot.slane %v5332_v6, 2  ;;  %v5333_v35 = vunpack.c.h.bf16 %v4450_v33 }
  0x52   : > { %3531 = vmatprep.mubr.msk.bf16.mxu0 %vm530_vm2, %v4651_v25  ;;  %v1069_v13 = vpack.c.bf16 %v4695_v56, %v4692_v31  ;;  %v1009_v15 = vsel %vm956_vm3, %v1007_v49, %v1008_v4  ;;  %v5336_v14 = vunpack.c.h.bf16 %v4468_v17  ;;  %v5337_v6 = vunpack.c.l.bf16 %v4476_v48  ;;  %v276_v56 = vld [vmem:[%s4206_s27 + $0xd4] sm:$0x1] }
  0x53   : > { %v1013_v20 = vrot.slane %v5333_v35, 2  ;;  %v1011_v41 = vsel %vm956_vm3, %v1008_v4, %v1010_v54  ;;  %v5335_v4 = vunpack.c.l.bf16 %v4468_v17  ;;  %v5338_v35 = vunpack.c.l.bf16 %v4521_v27 }
  0x54   : > { %v4731_v61 = vpack.c.bf16 %v1011_v41, %v1009_v15  ;;  %v1018_v54 = vrot.slane %v5336_v14, 2  ;;  %v5340_v15 = vunpack.c.l.bf16 %v4536_v44 }
  0x55   : > { %v1014_v34 = vsel %vm956_vm3, %v1012_v43, %v1013_v20  ;;  %v1017_v46 = vrot.slane %v5335_v4, 2  ;;  %v1020_v43 = vrot.slane %v5337_v6, 2  ;;  %v5341_v4 = vunpack.c.l.bf16 %v4545_v40 }
  0x56   : > { %3378 = vmatmul.mubr.msk.bf16.gmra.mrb[28].mxu1 %vm530_vm2, %v4677_v60  ;;  %v1025_v41 = vrot.slane %v5340_v15, 2  ;;  %v5342_v6 = vunpack.c.h.bf16 %v4545_v40 }
  0x57   : > { %3383 = vmatprep.mubr.msk.bf16.mxu1 %vm530_vm2, %v4210_v8  ;;  %v1015_v8 = vrot.slane %v5334_v2, 2  ;;  %v5339_v2 = vunpack.c.h.bf16 %v4521_v27  ;;  %v1019_v48 = vsel %vm956_vm3, %v1017_v46, %v1018_v54  ;;  %v1027_v14 = vrot.slane %v5341_v4, 2  ;;  %v273_v4 = vld [vmem:[%s4206_s27 + $0xc8] sm:$0x1] }
  0x59   : > { %3532 = vmatmul.mubr.msk.bf16.gmra.mrb[12].mxu0 %vm530_vm2, %v4687_v9  ;;  %v1016_v26 = vsel %vm956_vm3, %v1013_v20, %v1015_v8  ;;  %v1022_v20 = vrot.slane %v5338_v35, 2  ;;  %v1023_v8 = vrot.slane %v5339_v2, 2  ;;  %v1028_v35 = vrot.slane %v5342_v6, 2 }
  0x5a   : > { %3535 = vmatprep.mubr.msk.bf16.mxu0 %vm530_vm2, %v4699_v42  ;;  %v4735_v49 = vpack.c.bf16 %v1016_v26, %v1014_v34 }
  0x5b   : > { %v1024_v34 = vsel %vm956_vm3, %v1022_v20, %v1023_v8  ;;  %v1026_v44 = vsel %vm956_vm3, %v1023_v8, %v1025_v41  ;;  %v5344_v20 = vunpack.c.l.bf16 %v4596_v36  ;;  %v5345_v8 = vunpack.c.h.bf16 %v4596_v36 }
  0x5c   : > { %v4770_v46 = vpack.c.bf16 %v1026_v44, %v1024_v34  ;;  %v5346_v41 = vunpack.c.l.bf16 %v4599_v63  ;;  %v1029_v34 = vsel %vm956_vm3, %v1027_v14, %v1028_v35 }
  0x5d   : > { %v1032_v2 = vrot.slane %v5344_v20, 2  ;;  %v1033_v15 = vrot.slane %v5345_v8, 2 }
  0x5e   : > { %3384 = vmatmul.mubr.msk.bf16.vlgmr.msra.gmra.mrb[0].mxu1 %vm530_vm2, %v4216_v10 }
  0x5f   : > { %3416 = vmatpush3.bf16.msra.mxu1 %v1135_v24  ;;  %3387 = vmatprep.mubr.msk.bf16.mxu1 %vm530_vm2, %v4226_v16  ;;  %v1021_v24 = vsel %vm956_vm3, %v1018_v54, %v1020_v43  ;;  %v5343_v54 = vunpack.c.l.bf16 %v4548_v50  ;;  %v1034_v63 = vsel %vm956_vm3, %v1032_v2, %v1033_v15 }
  0x60   : > { %3914 = vmatprep.subr.msk.bf16.mxu1 %vm579_vm0, %v5306_v7  ;;  %v4762_v26 = vpack.c.bf16 %v1021_v24, %v1019_v48  ;;  %v1035_v48 = vrot.slane %v5346_v41, 2  ;;  %v4781_v24 = vld [vmem:[%s4206_s27 + $0xc0] sm:$0xff]  }
  0x61   : > { %3536 = vmatmul.mubr.msk.bf16.gmra.mrb[16].mxu0 %vm530_vm2, %v4731_v61  ;;  %v1030_v43 = vrot.slane %v5343_v54, 2  ;;  %v325_v44 = vunpack.c.l.bf16 %v4781_v24  ;;  %v326_v6 = vunpack.c.h.bf16 %v4781_v24  ;;  %v327_v54 = vunpack.c.l.bf16 %v273_v4 }
  0x62   : > { %3539 = vmatprep.mubr.msk.bf16.mxu0 %vm530_vm2, %v4735_v49  ;;  %v1036_v20 = vsel %vm956_vm3, %v1033_v15, %v1035_v48 }
  0x63   : > { %v1031_v50 = vsel %vm956_vm3, %v1028_v35, %v1030_v43  ;;  %v4800_v14 = vpack.c.bf16 %v1036_v20, %v1034_v63  ;;  %v1746_v35 = vrot.slane %v325_v44, 2  ;;  %v1747_v43 = vrot.slane %v326_v6, 2 }
  0x64   : > { %v4796_v8 = vpack.c.bf16 %v1031_v50, %v1029_v34  ;;  %v1749_v41 = vrot.slane %v327_v54, 2  ;;  %v1538_v4 = vrot.slane %v325_v44, 1  ;;  %v1539_v2 = vrot.slane %v326_v6, 1  ;;  %v2382_v6 = vld [vmem:[%s5266_s1 + $0x10] sm:$0x3] }
  0x65   : > { %v1541_v7 = vrot.slane %v327_v54, 1  ;;  %v1748_v15 = vsel %vm956_vm3, %v1746_v35, %v1747_v43  ;;  %v330_v35 = vunpack.c.l.bf16 %v276_v56 }
  0x66   : > { %3388 = vmatmul.mubr.msk.bf16.gmra.mrb[4].mxu1 %vm530_vm2, %v4249_v29  ;;  %v1750_v48 = vsel %vm956_vm3, %v1747_v43, %v1749_v41  ;;  %v1540_v34 = vsel %vm396_vm1, %v1538_v4, %v1539_v2 }
  0x67   : > { %3391 = vmatprep.mubr.msk.bf16.mxu1 %vm530_vm2, %v4261_v37  ;;  %v1542_v50 = vsel %vm396_vm1, %v1539_v2, %v1541_v7  ;;  %v4814_v20 = vpack.c.bf16 %v1750_v48, %v1748_v15  ;;  %v5347_v7 = vrot.slane %v4526_v5, 2  ;;  %v5348_v5 = vrot.slane %v4716_v38, 2 }
  0x68   : > { %v4810_v63 = vpack.c.bf16 %v1542_v50, %v1540_v34  ;;  %v2377_v43 = vrot.slane %v330_v35, 2  ;;  %v2387_v15 = vsel %vm579_vm0, %v2382_v6, 0 }
  0x69   : > { %3540 = vmatmul.mubr.msk.bf16.gmra.mrb[20].mxu0 %vm530_vm2, %v4762_v26  ;;  %v2179_v44 = vsel %vm579_vm0, %v5347_v7, 0  ;;  %v1340_v54 = vsel %vm579_vm0, %v5348_v5, 0 }
  0x6a   : > { %3543 = vmatprep.mubr.msk.bf16.mxu0 %vm530_vm2, %v4770_v46 }
  0x6e   : > { %3392 = vmatmul.mubr.msk.bf16.gmra.mrb[8].mxu1 %vm530_vm2, %v4289_v51 }
  0x6f   : > { %3395 = vmatprep.mubr.msk.bf16.mxu1 %vm530_vm2, %v4299_v57 }
  0x71   : > { %3544 = vmatmul.mubr.msk.bf16.gmra.mrb[24].mxu0 %vm530_vm2, %v4796_v8 }
  0x72   : > { %3547 = vmatprep.mubr.msk.bf16.mxu0 %vm530_vm2, %v4800_v14 }
  0x76   : > { %3396 = vmatmul.mubr.msk.bf16.gmra.mrb[12].mxu1 %vm530_vm2, %v4333_v21 }
  0x77   : > { %3399 = vmatprep.mubr.msk.bf16.mxu1 %vm530_vm2, %v4369_v53 }
  0x79   : > { %3548 = vmatmul.mubr.msk.bf16.gmra.mrb[28].mxu0 %vm530_vm2, %v4814_v20 }
  0x7a   : > { %3553 = vmatprep.mubr.msk.bf16.mxu0 %vm530_vm2, %v4226_v16 }
  0x7e   : > { %3400 = vmatmul.mubr.msk.bf16.gmra.mrb[16].mxu1 %vm530_vm2, %v4394_v32 }
  0x7f   : > { %3403 = vmatprep.mubr.msk.bf16.mxu1 %vm530_vm2, %v4412_v52 }
  0x81   : > { %3554 = vmatmul.mubr.msk.bf16.vlgmr.msra.gmra.mrb[0].mxu0 %vm530_vm2, %v4249_v29 }
  0x82   : > { %3586 = vmatpush3.bf16.msra.mxu0 %v2179_v44  ;;  %3557 = vmatprep.mubr.msk.bf16.mxu0 %vm530_vm2, %v4261_v37 }
  0x83   : > { %3920 = vmatprep.subr.msk.bf16.mxu0 %vm579_vm0, %v2382_v6 }
  0x86   : > { %3404 = vmatmul.mubr.msk.bf16.gmra.mrb[20].mxu1 %vm530_vm2, %v4450_v33 }
  0x87   : > { %3407 = vmatprep.mubr.msk.bf16.mxu1 %vm530_vm2, %v4468_v17 }
  0x89   : > { %3558 = vmatmul.mubr.msk.bf16.gmra.mrb[4].mxu0 %vm530_vm2, %v4289_v51 }
  0x8a   : > { %3561 = vmatprep.mubr.msk.bf16.mxu0 %vm530_vm2, %v4299_v57 }
  0x8e   : > { %3408 = vmatmul.mubr.msk.bf16.gmra.mrb[24].mxu1 %vm530_vm2, %v4521_v27 }
  0x8f   : > { %3411 = vmatprep.mubr.msk.bf16.mxu1 %vm530_vm2, %v4545_v40 }
  0x91   : > { %3562 = vmatmul.mubr.msk.bf16.gmra.mrb[8].mxu0 %vm530_vm2, %v4333_v21 }
  0x92   : > { %3565 = vmatprep.mubr.msk.bf16.mxu0 %vm530_vm2, %v4369_v53 }
  0x96   : > { %3412 = vmatmul.mubr.msk.bf16.gmra.mrb[28].mxu1 %vm530_vm2, %v4596_v36 }
  0x97   : > { %3417 = vmatprep.mubr.msk.bf16.mxu1 %vm530_vm2, %v1069_v13 }
  0x99   : > { %3566 = vmatmul.mubr.msk.bf16.gmra.mrb[12].mxu0 %vm530_vm2, %v4394_v32 }
  0x9a   : > { %3569 = vmatprep.mubr.msk.bf16.mxu0 %vm530_vm2, %v4412_v52 }
  0x9e   : > { %3418 = vmatmul.mubr.msk.bf16.vlgmr.msra.gmra.mrb[0].mxu1 %vm530_vm2, %v4459_v11 }
  0x9f   : > { %3450 = vmatpush3.bf16.msra.mxu1 %v1340_v54  ;;  %3421 = vmatprep.mubr.msk.bf16.mxu1 %vm530_vm2, %v4507_v39 }
  0xa0   : > { %3916 = vmatprep.subr.msk.bf16.mxu1 %vm579_vm0, %v4182_v1  ;;  %v274_v1 = vld [vmem:[%s4206_s27 + $0xcc] sm:$0xff]  }
  0xa1   : > { %3570 = vmatmul.mubr.msk.bf16.gmra.mrb[16].mxu0 %vm530_vm2, %v4450_v33  ;;  %v328_v11 = vunpack.c.l.bf16 %v274_v1  ;;  %v329_v31 = vunpack.c.h.bf16 %v274_v1 }
  0xa2   : > { %3573 = vmatprep.mubr.msk.bf16.mxu0 %vm530_vm2, %v4468_v17 }
  0xa3   : > { %v2374_v13 = vrot.slane %v328_v11, 2  ;;  %v2375_v38 = vrot.slane %v329_v31, 2 }
  0xa5   : > { %v4897_v41 = vsel %vm956_vm3, %v2374_v13, %v2375_v38  ;;  %v4902_v4 = vsel %vm956_vm3, %v2375_v38, %v2377_v43 }
  0xa6   : > { %3422 = vmatmul.mubr.msk.bf16.gmra.mrb[4].mxu1 %vm530_vm2, %v4560_v55  ;;  %v2381_v2 = vpack.c.bf16 %v4902_v4, %v4897_v41 }
  0xa7   : > { %3425 = vmatprep.mubr.msk.bf16.mxu1 %vm530_vm2, %v4587_v22 }
  0xa9   : > { %3574 = vmatmul.mubr.msk.bf16.gmra.mrb[20].mxu0 %vm530_vm2, %v4521_v27 }
  0xaa   : > { %3577 = vmatprep.mubr.msk.bf16.mxu0 %vm530_vm2, %v4545_v40 }
  0xae   : > { %3426 = vmatmul.mubr.msk.bf16.gmra.mrb[8].mxu1 %vm530_vm2, %v4604_v0 }
  0xaf   : > { %3429 = vmatprep.mubr.msk.bf16.mxu1 %vm530_vm2, %v4649_v3 }
  0xb1   : > { %3578 = vmatmul.mubr.msk.bf16.gmra.mrb[24].mxu0 %vm530_vm2, %v4596_v36 }
  0xb2   : > { %3581 = vmatprep.mubr.msk.bf16.mxu0 %vm530_vm2, %v4781_v24 }
  0xb6   : > { %3430 = vmatmul.mubr.msk.bf16.gmra.mrb[12].mxu1 %vm530_vm2, %v4651_v25 }
  0xb7   : > { %3433 = vmatprep.mubr.msk.bf16.mxu1 %vm530_vm2, %v4687_v9 }
  0xb9   : > { %3582 = vmatmul.mubr.msk.bf16.gmra.mrb[28].mxu0 %vm530_vm2, %v274_v1 }
  0xba   : > { %3587 = vmatprep.mubr.msk.bf16.mxu0 %vm530_vm2, %v4301_v58  ;;  %v5350_v58 = vld [vmem:[#allocation3_spill] sm:$0xff] }
  0xbe   : > { %3434 = vmatmul.mubr.msk.bf16.gmra.mrb[16].mxu1 %vm530_vm2, %v4699_v42 }
  0xbf   : > { %3437 = vmatprep.mubr.msk.bf16.mxu1 %vm530_vm2, %v4731_v61 }
  0xc1   : > { %3588 = vmatmul.mubr.msk.bf16.vlgmr.msra.gmra.mrb[0].mxu0 %vm530_vm2, %v4335_v23  ;;  %v2165_v23 = vrot.slane %v330_v35, 1 }
  0xc2   : > { %3620 = vmatpush3.bf16.msra.mxu0 %v2387_v15  ;;  %3591 = vmatprep.mubr.msk.bf16.mxu0 %vm530_vm2, %v4344_v30 }
  0xc6   : > { %3438 = vmatmul.mubr.msk.bf16.gmra.mrb[20].mxu1 %vm530_vm2, %v4735_v49 }
  0xc7   : > { %3441 = vmatprep.mubr.msk.bf16.mxu1 %vm530_vm2, %v4762_v26 }
  0xc9   : > { %3592 = vmatmul.mubr.msk.bf16.gmra.mrb[4].mxu0 %vm530_vm2, %v4373_v59 }
  0xca   : > { %3595 = vmatprep.mubr.msk.bf16.mxu0 %vm530_vm2, %v4407_v12  ;;  %v5349_v12 = vld [vmem:[#allocation2_spill] sm:$0xff] }
  0xce   : > { %3442 = vmatmul.mubr.msk.bf16.gmra.mrb[24].mxu1 %vm530_vm2, %v4770_v46 }
  0xcf   : > { %3445 = vmatprep.mubr.msk.bf16.mxu1 %vm530_vm2, %v4796_v8 }
  0xd1   : > { %3596 = vmatmul.mubr.msk.bf16.gmra.mrb[8].mxu0 %vm530_vm2, %v4427_v62 }
  0xd2   : > { %3599 = vmatprep.mubr.msk.bf16.mxu0 %vm530_vm2, %v4470_v18 }
  0xd6   : > { %3446 = vmatmul.mubr.msk.bf16.gmra.mrb[28].mxu1 %vm530_vm2, %v4800_v14 }
  0xd7   : > { %3451 = vmatprep.mubr.msk.bf16.mxu1 %vm530_vm2, %v4216_v10  ;;  %v5351_v10 = vld [vmem:[#allocation4_spill] sm:$0xff] }
  0xd9   : > { %3600 = vmatmul.mubr.msk.bf16.gmra.mrb[12].mxu0 %vm530_vm2, %v4505_v45 }
  0xda   : > { %3603 = vmatprep.mubr.msk.bf16.mxu0 %vm530_vm2, %v4513_v47 }
  0xde   : > { %3452 = vmatmul.mubr.msk.bf16.vlgmr.msra.gmra.mrb[0].mxu1 %vm530_vm2, %v4226_v16  ;;  %v2162_v16 = vrot.slane %v328_v11, 1 }
  0xdf   : > { %3654 = vmatpush3.bf16.msra.mxu1 %v5349_v12  ;;  %3455 = vmatprep.mubr.msk.bf16.mxu1 %vm530_vm2, %v4249_v29  ;;  %v2163_v29 = vrot.slane %v329_v31, 1 }
  0xe1   : > { %3604 = vmatmul.mubr.msk.bf16.gmra.mrb[16].mxu0 %vm530_vm2, %v5350_v58 }
  0xe2   : > { %3607 = vmatprep.mubr.msk.bf16.mxu0 %vm530_vm2, %v4583_v19 }
  0xe6   : > { %3456 = vmatmul.mubr.msk.bf16.gmra.mrb[4].mxu1 %vm530_vm2, %v4261_v37  ;;  %v2164_v37 = vsel %vm396_vm1, %v2162_v16, %v2163_v29 }
  0xe7   : > { %3459 = vmatprep.mubr.msk.bf16.mxu1 %vm530_vm2, %v4289_v51  ;;  %v2166_v51 = vsel %vm396_vm1, %v2163_v29, %v2165_v23 }
  0xe9   : > { %3608 = vmatmul.mubr.msk.bf16.gmra.mrb[20].mxu0 %vm530_vm2, %v4632_v28 }
  0xea   : > { %3611 = vmatprep.mubr.msk.bf16.mxu0 %vm530_vm2, %v5351_v10 }
  0xee   : > { %3460 = vmatmul.mubr.msk.bf16.gmra.mrb[8].mxu1 %vm530_vm2, %v4299_v57  ;;  %v2169_v57 = vpack.c.bf16 %v2166_v51, %v2164_v37 }
  0xef   : > { %3463 = vmatprep.mubr.msk.bf16.mxu1 %vm530_vm2, %v4333_v21 }
  0xf1   : > { %3612 = vmatmul.mubr.msk.bf16.gmra.mrb[24].mxu0 %vm530_vm2, %v4677_v60 }
  0xf2   : > { %3615 = vmatprep.mubr.msk.bf16.mxu0 %vm530_vm2, %v4810_v63 }
  0xf6   : > { %3464 = vmatmul.mubr.msk.bf16.gmra.mrb[12].mxu1 %vm530_vm2, %v4369_v53 }
  0xf7   : > { %3467 = vmatprep.mubr.msk.bf16.mxu1 %vm530_vm2, %v4394_v32 }
  0xf9   : > { %3616 = vmatmul.mubr.msk.bf16.gmra.mrb[28].mxu0 %vm530_vm2, %v2169_v57 }
  0xfa   : > { %3621 = vmatprep.mubr.msk.bf16.mxu0 %vm530_vm2, %v4507_v39 }
  0xfe   : > { %3468 = vmatmul.mubr.msk.bf16.gmra.mrb[16].mxu1 %vm530_vm2, %v4412_v52 }
  0xff   : > { %3471 = vmatprep.mubr.msk.bf16.mxu1 %vm530_vm2, %v4450_v33 }
 0x101   : > { %3622 = vmatmul.mubr.msk.bf16.vlgmr.msra.gmra.mrb[0].mxu0 %vm530_vm2, %v4560_v55 }
 0x102   : > { %3625 = vmatprep.mubr.msk.bf16.mxu0 %vm530_vm2, %v4587_v22  ;;  %v5051_v22 = vld [vmem:[%s5267_s2] ss:$0 sm:$0xff] }
 0x106   : > { %3472 = vmatmul.mubr.msk.bf16.gmra.mrb[20].mxu1 %vm530_vm2, %v4468_v17 }
 0x107   : > { %3475 = vmatprep.mubr.msk.bf16.mxu1 %vm530_vm2, %v4521_v27 }
 0x109   : > { %3626 = vmatmul.mubr.msk.bf16.gmra.mrb[4].mxu0 %vm530_vm2, %v4604_v0 }
 0x10a   : > { %3629 = vmatprep.mubr.msk.bf16.mxu0 %vm530_vm2, %v4649_v3 }
 0x10e   : > { %3476 = vmatmul.mubr.msk.bf16.gmra.mrb[24].mxu1 %vm530_vm2, %v4545_v40 }
 0x10f   : > { %3479 = vmatprep.mubr.msk.bf16.mxu1 %vm530_vm2, %v4596_v36 }
 0x111   : > { %3630 = vmatmul.mubr.msk.bf16.gmra.mrb[8].mxu0 %vm530_vm2, %v4651_v25 }
 0x112   : > { %3633 = vmatprep.mubr.msk.bf16.mxu0 %vm530_vm2, %v4687_v9 }
 0x116   : > { %3480 = vmatmul.mubr.msk.bf16.gmra.mrb[28].mxu1 %vm530_vm2, %v4781_v24 }
 0x117   : > { %3501 = vmatprep.mubr.msk.bf16.mxu1 %vm530_vm2, %v4505_v45 }
 0x119   : > { %3634 = vmatmul.mubr.msk.bf16.gmra.mrb[12].mxu0 %vm530_vm2, %v4699_v42 }
 0x11a   : > { %3637 = vmatprep.mubr.msk.bf16.mxu0 %vm530_vm2, %v4731_v61 }
 0x11e   : > { %3502 = vmatmul.mubr.msk.bf16.vlgmr.msra.gmra.mrb[16].mxu1 %vm530_vm2, %v4513_v47 }
 0x11f   : > { %3505 = vmatprep.mubr.msk.bf16.mxu1 %vm530_vm2, %v5350_v58 }
 0x121   : > { %3638 = vmatmul.mubr.msk.bf16.gmra.mrb[16].mxu0 %vm530_vm2, %v4735_v49 }
 0x122   : > { %3641 = vmatprep.mubr.msk.bf16.mxu0 %vm530_vm2, %v4762_v26 }
 0x126   : > { %3506 = vmatmul.mubr.msk.bf16.gmra.mrb[20].mxu1 %vm530_vm2, %v4583_v19 }
 0x127   : > { %3509 = vmatprep.mubr.msk.bf16.mxu1 %vm530_vm2, %v4632_v28 }
 0x129   : > { %3642 = vmatmul.mubr.msk.bf16.gmra.mrb[20].mxu0 %vm530_vm2, %v4770_v46 }
 0x12a   : > { %3645 = vmatprep.mubr.msk.bf16.mxu0 %vm530_vm2, %v4796_v8 }
 0x12e   : > { %3510 = vmatmul.mubr.msk.bf16.gmra.mrb[24].mxu1 %vm530_vm2, %v5351_v10 }
 0x12f   : > { %3513 = vmatprep.mubr.msk.bf16.mxu1 %vm530_vm2, %v4677_v60 }
 0x131   : > { %3646 = vmatmul.mubr.msk.bf16.gmra.mrb[24].mxu0 %vm530_vm2, %v4800_v14 }
 0x132   : > { %3649 = vmatprep.mubr.msk.bf16.mxu0 %vm530_vm2, %v4814_v20 }
 0x136   : > { %3514 = vmatmul.mubr.msk.bf16.gmra.mrb[28].mxu1 %vm530_vm2, %v4810_v63 }
 0x139   : > { %3650 = vmatmul.mubr.msk.bf16.gmra.mrb[28].mxu0 %vm530_vm2, %v2381_v2 }
 0x1b1   : > { %v3453_v21 = vpop.f32.mrb[0].mxu1 }
 0x1b2   : > { %v1376_v30 = vpop.f32.mrb[1].mxu1 }
 0x1b3   : > { %v3454_v52 = vpop.f32.mrb[2].mxu1 }
 0x1b4   : > { %v1379_v53 = vpop.f32.mrb[3].mxu1 }
 0x1b9   : > { %v3457_v59 = vpop.f32.mrb[4].mxu1 }
 0x1ba   : > { %v1392_v32 = vpop.f32.mrb[5].mxu1 }
 0x1bb   : > { %v3458_v18 = vpop.f32.mrb[6].mxu1 }
 0x1bc   : > { %v1395_v62 = vpop.f32.mrb[7].mxu1 }
 0x1c1   : > { %v3461_v33 = vpop.f32.mrb[8].mxu1 }
 0x1c2   : > { %v1408_v17 = vpop.f32.mrb[9].mxu1 }
 0x1c3   : > { %v3462_v45 = vpop.f32.mrb[10].mxu1 }
 0x1c4   : > { %v5038_v39 = vpop.f32.mrb[11].mxu1 }
 0x1c9   : > { %v5040_v47 = vpop.f32.mrb[12].mxu1 }
 0x1ca   : > { %v5042_v27 = vpop.f32.mrb[13].mxu1 }
 0x1cb   : > { %v5044_v40 = vpop.f32.mrb[14].mxu1 }
 0x1cc   : > { %v5046_v55 = vpop.f32.mrb[15].mxu1 }
 0x1d4   : > { %v3623_v19 = vpop.f32.mrb[0].mxu0 }
 0x1d5   : > { %v3655_v36 = vadd.f32 %v3623_v19, %v3453_v21  ;;  %v2423_v0 = vpop.f32.mrb[1].mxu0 }
 0x1d6   : > { %v3656_v28 = vadd.f32 %v2423_v0, %v1376_v30  ;;  %v3624_v3 = vpop.f32.mrb[2].mxu0 }
 0x1d7   : > { %v5054_v25 = vadd.f32 %v3655_v36, %v5051_v22  ;;  %v3657_v60 = vadd.f32 %v3624_v3, %v3454_v52  ;;  %v2426_v9 = vpop.f32.mrb[3].mxu0 }
 0x1d8   : > { %v5057_v42 = vadd.f32 %v3656_v28, %v5051_v22  ;;  %v3658_v61 = vadd.f32 %v2426_v9, %v1379_v53 }
 0x1d9   : > { %v3161_v49 = vmul.f32 -1.442695, %v5054_v25  ;;  %v5061_v26 = vadd.f32 %v3657_v60, %v5051_v22 }
 0x1da   : > { %v3159_v46 = vmul.f32 -1.442695, %v5057_v42  ;;  %v5065_v24 = vadd.f32 %v3658_v61, %v5051_v22 }
 0x1db   : > { %3986 = vpow2.f32 %v3161_v49  ;;  %v3162_v8 = vmul.f32 -1.442695, %v5061_v26 }
 0x1dc   : > { %3988 = vpow2.f32 %v3159_v46  ;;  %v3160_v14 = vmul.f32 -1.442695, %v5065_v24  ;;  %v3627_v48 = vpop.f32.mrb[4].mxu0 }
 0x1dd   : > { %3990 = vpow2.f32 %v3162_v8  ;;  %v3659_v34 = vadd.f32 %v3627_v48, %v3457_v59  ;;  %v2439_v50 = vpop.f32.mrb[5].mxu0 }
 0x1de   : > { %3992 = vpow2.f32 %v3160_v14  ;;  %v3660_v63 = vadd.f32 %v2439_v50, %v1392_v32  ;;  %v3628_v20 = vpop.f32.mrb[6].mxu0 }
 0x1df   : > { %v5070_v7 = vadd.f32 %v3659_v34, %v5051_v22  ;;  %v3661_v44 = vadd.f32 %v3628_v20, %v3458_v18  ;;  %v2442_v6 = vpop.f32.mrb[7].mxu0 }
 0x1e0   : > { %v5073_v5 = vadd.f32 %v3660_v63, %v5051_v22  ;;  %v3662_v54 = vadd.f32 %v2442_v6, %v1395_v62 }
 0x1e1   : > { %v3165_v1 = vmul.f32 -1.442695, %v5070_v7  ;;  %v5077_v11 = vadd.f32 %v3661_v44, %v5051_v22 }
 0x1e2   : > { %v3163_v31 = vmul.f32 -1.442695, %v5073_v5  ;;  %v5081_v56 = vadd.f32 %v3662_v54, %v5051_v22 }
 0x1e3   : > { %3994 = vpow2.f32 %v3165_v1  ;;  %v3166_v13 = vmul.f32 -1.442695, %v5077_v11 }
 0x1e4   : > { %3996 = vpow2.f32 %v3163_v31  ;;  %v3164_v38 = vmul.f32 -1.442695, %v5081_v56  ;;  %v3631_v35 = vpop.f32.mrb[8].mxu0 }
 0x1e5   : > { %v3987_v43 = vpop.eup %3986  ;;  %3998 = vpow2.f32 %v3166_v13  ;;  %v3663_v41 = vadd.f32 %v3631_v35, %v3461_v33  ;;  %v2455_v4 = vpop.f32.mrb[9].mxu0 }
 0x1e6   : > { %v3989_v2 = vpop.eup %3988  ;;  %v2719_v15 = vadd.f32 1.0, %v3987_v43  ;;  %4000 = vpow2.f32 %v3164_v38  ;;  %v3664_v12 = vadd.f32 %v2455_v4, %v1408_v17  ;;  %v3632_v58 = vpop.f32.mrb[10].mxu0 }
 0x1e7   : > { %v3991_v10 = vpop.eup %3990  ;;  %v2717_v16 = vadd.f32 1.0, %v3989_v2  ;;  %v5086_v29 = vadd.f32 %v3663_v41, %v5051_v22  ;;  %v3665_v23 = vadd.f32 %v3632_v58, %v3462_v45  ;;  %v2458_v37 = vpop.f32.mrb[11].mxu0 }
 0x1e8   : > { %v3993_v51 = vpop.eup %3992  ;;  %4002 = vrcp.f32 %v2719_v15  ;;  %v2720_v57 = vadd.f32 1.0, %v3991_v10  ;;  %v5089_v21 = vadd.f32 %v3664_v12, %v5051_v22  ;;  %v3666_v30 = vadd.f32 %v2458_v37, %v5038_v39 }
 0x1e9   : > { %4004 = vrcp.f32 %v2717_v16  ;;  %v2718_v52 = vadd.f32 1.0, %v3993_v51  ;;  %v3169_v53 = vmul.f32 -1.442695, %v5086_v29  ;;  %v5094_v59 = vadd.f32 %v3665_v23, %v5051_v22 }
 0x1ea   : > { %4006 = vrcp.f32 %v2720_v57  ;;  %v3167_v32 = vmul.f32 -1.442695, %v5089_v21  ;;  %v5098_v18 = vadd.f32 %v3666_v30, %v5051_v22 }
 0x1eb   : > { %4008 = vrcp.f32 %v2718_v52  ;;  %v3170_v62 = vmul.f32 -1.442695, %v5094_v59 }
 0x1ec   : > { %4010 = vpow2.f32 %v3169_v53  ;;  %v3168_v33 = vmul.f32 -1.442695, %v5098_v18  ;;  %v3635_v17 = vpop.f32.mrb[12].mxu0 }
 0x1ed   : > { %v3995_v45 = vpop.eup %3994  ;;  %4012 = vpow2.f32 %v3167_v32  ;;  %v3667_v39 = vadd.f32 %v3635_v17, %v5040_v47  ;;  %v2471_v19 = vpop.f32.mrb[13].mxu0 }
 0x1ee   : > { %v3997_v36 = vpop.eup %3996  ;;  %v2723_v0 = vadd.f32 1.0, %v3995_v45  ;;  %4014 = vpow2.f32 %v3170_v62  ;;  %v3668_v28 = vadd.f32 %v2471_v19, %v5042_v27  ;;  %v3636_v3 = vpop.f32.mrb[14].mxu0 }
 0x1ef   : > { %v3999_v60 = vpop.eup %3998  ;;  %v2721_v9 = vadd.f32 1.0, %v3997_v36  ;;  %4016 = vpow2.f32 %v3168_v33  ;;  %v5106_v61 = vadd.f32 %v3667_v39, %v5051_v22  ;;  %v3669_v49 = vadd.f32 %v3636_v3, %v5044_v40  ;;  %v2474_v46 = vpop.f32.mrb[15].mxu0 }
 0x1f0   : > { %v4001_v8 = vpop.eup %4000  ;;  %4018 = vrcp.f32 %v2723_v0  ;;  %v2724_v47 = vadd.f32 1.0, %v3999_v60  ;;  %v5110_v14 = vadd.f32 %v3668_v28, %v5051_v22  ;;  %v3670_v48 = vadd.f32 %v2474_v46, %v5046_v55 }
 0x1f1   : > { %v3503_v27 = vpop.f32.mrb[16].mxu1  ;;  %4020 = vrcp.f32 %v2721_v9  ;;  %v2722_v34 = vadd.f32 1.0, %v4001_v8  ;;  %v3173_v50 = vmul.f32 -1.442695, %v5106_v61  ;;  %v5115_v63 = vadd.f32 %v3669_v49, %v5051_v22 }
 0x1f2   : > { %v1651_v20 = vpop.f32.mrb[17].mxu1  ;;  %v4003_v44 = vpop.eup %4002  ;;  %4022 = vrcp.f32 %v2724_v47  ;;  %v3171_v40 = vmul.f32 -1.442695, %v5110_v14  ;;  %v5124_v55 = vadd.f32 %v3670_v48, %v5051_v22 }
 0x1f3   : > { %v3504_v6 = vpop.f32.mrb[18].mxu1  ;;  %v4005_v54 = vpop.eup %4004  ;;  %v2815_v1 = vmul.f32 %v4003_v44, %v5054_v25  ;;  %4024 = vrcp.f32 %v2722_v34  ;;  %v3174_v31 = vmul.f32 -1.442695, %v5115_v63 }
 0x1f4   : > { %v1654_v13 = vpop.f32.mrb[19].mxu1  ;;  %v4007_v38 = vpop.eup %4006  ;;  %v2813_v35 = vmul.f32 %v4005_v54, %v5057_v42  ;;  %4026 = vpow2.f32 %v3173_v50  ;;  %v3172_v43 = vmul.f32 -1.442695, %v5124_v55 }
 0x1f5   : > { %v3639_v41 = vpop.f32.mrb[16].mxu0  ;;  %v4009_v4 = vpop.eup %4008  ;;  %2847 = vst [vmem:[%s5120_s19 + $0x10] sm:$0xff] %v2815_v1  ;;  %v2816_v2 = vmul.f32 %v4007_v38, %v5061_v26  ;;  %4028 = vpow2.f32 %v3171_v40 }
 0x1f6   : > { %v3671_v15 = vadd.f32 %v3639_v41, %v3503_v27  ;;  %v2487_v25 = vpop.f32.mrb[17].mxu0  ;;  %v4011_v12 = vpop.eup %4010  ;;  %2845 = vst [vmem:[%s5120_s19] sm:$0xff] %v2813_v35  ;;  %v2814_v58 = vmul.f32 %v4009_v4, %v5065_v24  ;;  %4030 = vpow2.f32 %v3174_v31 }
 0x1f7   : > { %v3672_v10 = vadd.f32 %v2487_v25, %v1651_v20  ;;  %v3640_v42 = vpop.f32.mrb[18].mxu0  ;;  %v4013_v16 = vpop.eup %4012  ;;  %2848 = vst [vmem:[%s5120_s19 + $0x18] sm:$0xff] %v2816_v2  ;;  %v2727_v23 = vadd.f32 1.0, %v4011_v12  ;;  %4032 = vpow2.f32 %v3172_v43 }
 0x1f8   : > { %v5136_v37 = vadd.f32 %v3671_v15, %v5051_v22  ;;  %v3673_v51 = vadd.f32 %v3640_v42, %v3504_v6  ;;  %v2490_v26 = vpop.f32.mrb[19].mxu0  ;;  %v4015_v57 = vpop.eup %4014  ;;  %2846 = vst [vmem:[%s5120_s19 + $0x8] sm:$0xff] %v2814_v58  ;;  %v2725_v30 = vadd.f32 1.0, %v4013_v16 }
 0x1f9   : > { %v5140_v52 = vadd.f32 %v3672_v10, %v5051_v22  ;;  %v3674_v53 = vadd.f32 %v2490_v26, %v1654_v13  ;;  %v3507_v24 = vpop.f32.mrb[20].mxu1  ;;  %v4017_v32 = vpop.eup %4016  ;;  %4034 = vrcp.f32 %v2727_v23  ;;  %v2728_v62 = vadd.f32 1.0, %v4015_v57 }
 0x1fa   : > { %v3177_v33 = vmul.f32 -1.442695, %v5136_v37  ;;  %v5144_v17 = vadd.f32 %v3673_v51, %v5051_v22  ;;  %v1667_v45 = vpop.f32.mrb[21].mxu1  ;;  %v4019_v39 = vpop.eup %4018  ;;  %4036 = vrcp.f32 %v2725_v30  ;;  %v2726_v19 = vadd.f32 1.0, %v4017_v32 }
 0x1fb   : > { %v3175_v36 = vmul.f32 -1.442695, %v5140_v52  ;;  %v5148_v0 = vadd.f32 %v3674_v53, %v5051_v22  ;;  %v3508_v28 = vpop.f32.mrb[22].mxu1  ;;  %v4021_v3 = vpop.eup %4020  ;;  %v2819_v60 = vmul.f32 %v4019_v39, %v5070_v7  ;;  %4038 = vrcp.f32 %v2728_v62 }
 0x1fc   : > { %v3178_v9 = vmul.f32 -1.442695, %v5144_v17  ;;  %v1670_v49 = vpop.f32.mrb[23].mxu1  ;;  %v4023_v46 = vpop.eup %4022  ;;  %v2817_v8 = vmul.f32 %v4021_v3, %v5073_v5  ;;  %4040 = vrcp.f32 %v2726_v19 }
 0x1fd   : > { %v3176_v47 = vmul.f32 -1.442695, %v5148_v0  ;;  %v3643_v48 = vpop.f32.mrb[20].mxu0  ;;  %v4025_v27 = vpop.eup %4024  ;;  %2851 = vst [vmem:[%s5120_s19 + $0x30] sm:$0xff] %v2819_v60  ;;  %v2820_v34 = vmul.f32 %v4023_v46, %v5077_v11  ;;  %4042 = vpow2.f32 %v3177_v33 }
 0x1fe   : > { %v3675_v50 = vadd.f32 %v3643_v48, %v3507_v24  ;;  %v2503_v7 = vpop.f32.mrb[21].mxu0  ;;  %v4027_v20 = vpop.eup %4026  ;;  %2849 = vst [vmem:[%s5120_s19 + $0x20] sm:$0xff] %v2817_v8  ;;  %v2818_v44 = vmul.f32 %v4025_v27, %v5081_v56  ;;  %4044 = vpow2.f32 %v3175_v36 }
 0x1ff   : > { %v3676_v40 = vadd.f32 %v2503_v7, %v1667_v45  ;;  %v3644_v5 = vpop.f32.mrb[22].mxu0  ;;  %v4029_v6 = vpop.eup %4028  ;;  %2852 = vst [vmem:[%s5120_s19 + $0x38] sm:$0xff] %v2820_v34  ;;  %v2731_v54 = vadd.f32 1.0, %v4027_v20  ;;  %4046 = vpow2.f32 %v3178_v9 }
 0x200   : > { %v5160_v1 = vadd.f32 %v3675_v50, %v5051_v22  ;;  %v3677_v31 = vadd.f32 %v3644_v5, %v3508_v28  ;;  %v2506_v11 = vpop.f32.mrb[23].mxu0  ;;  %v4031_v13 = vpop.eup %4030  ;;  %2850 = vst [vmem:[%s5120_s19 + $0x28] sm:$0xff] %v2818_v44  ;;  %v2729_v38 = vadd.f32 1.0, %v4029_v6  ;;  %4048 = vpow2.f32 %v3176_v47 }
 0x201   : > { %v5164_v35 = vadd.f32 %v3676_v40, %v5051_v22  ;;  %v3678_v56 = vadd.f32 %v2506_v11, %v1670_v49  ;;  %v3511_v43 = vpop.f32.mrb[24].mxu1  ;;  %v4033_v41 = vpop.eup %4032  ;;  %4050 = vrcp.f32 %v2731_v54  ;;  %v2732_v4 = vadd.f32 1.0, %v4031_v13 }
 0x202   : > { %v3181_v2 = vmul.f32 -1.442695, %v5160_v1  ;;  %v5168_v15 = vadd.f32 %v3677_v31, %v5051_v22  ;;  %v1683_v25 = vpop.f32.mrb[25].mxu1  ;;  %4052 = vrcp.f32 %v2729_v38  ;;  %v2730_v12 = vadd.f32 1.0, %v4033_v41 }
 0x203   : > { %v3179_v58 = vmul.f32 -1.442695, %v5164_v35  ;;  %v5172_v10 = vadd.f32 %v3678_v56, %v5051_v22  ;;  %v3512_v42 = vpop.f32.mrb[26].mxu1  ;;  %v4035_v16 = vpop.eup %4034  ;;  %4054 = vrcp.f32 %v2732_v4 }
 0x204   : > { %v3182_v23 = vmul.f32 -1.442695, %v5168_v15  ;;  %v1686_v51 = vpop.f32.mrb[27].mxu1  ;;  %v4037_v26 = vpop.eup %4036  ;;  %v2823_v57 = vmul.f32 %v4035_v16, %v5086_v29  ;;  %4056 = vrcp.f32 %v2730_v12 }
 0x205   : > { %v3180_v30 = vmul.f32 -1.442695, %v5172_v10  ;;  %v3647_v53 = vpop.f32.mrb[24].mxu0  ;;  %v4039_v24 = vpop.eup %4038  ;;  %v2821_v32 = vmul.f32 %v4037_v26, %v5089_v21  ;;  %4058 = vpow2.f32 %v3181_v2 }
 0x206   : > { %v3679_v62 = vadd.f32 %v3647_v53, %v3511_v43  ;;  %v2519_v33 = vpop.f32.mrb[25].mxu0  ;;  %v4041_v45 = vpop.eup %4040  ;;  %2855 = vst [vmem:[%s5120_s19 + $0x50] sm:$0xff] %v2823_v57  ;;  %v2824_v39 = vmul.f32 %v4039_v24, %v5094_v59  ;;  %4060 = vpow2.f32 %v3179_v58 }
 0x207   : > { %v3680_v19 = vadd.f32 %v2519_v33, %v1683_v25  ;;  %v3648_v36 = vpop.f32.mrb[26].mxu0  ;;  %v4043_v29 = vpop.eup %4042  ;;  %2853 = vst [vmem:[%s5120_s19 + $0x40] sm:$0xff] %v2821_v32  ;;  %v2822_v28 = vmul.f32 %v4041_v45, %v5098_v18  ;;  %4062 = vpow2.f32 %v3182_v23 }
 0x208   : > { %v5183_v3 = vadd.f32 %v3679_v62, %v5051_v22  ;;  %v3681_v21 = vadd.f32 %v3648_v36, %v3512_v42  ;;  %v2522_v60 = vpop.f32.mrb[27].mxu0  ;;  %v4045_v9 = vpop.eup %4044  ;;  %2856 = vst [vmem:[%s5120_s19 + $0x58] sm:$0xff] %v2824_v39  ;;  %v2735_v49 = vadd.f32 1.0, %v4043_v29  ;;  %4064 = vpow2.f32 %v3180_v30 }
 0x209   : > { %v5187_v59 = vadd.f32 %v3680_v19, %v5051_v22  ;;  %v3682_v46 = vadd.f32 %v2522_v60, %v1686_v51  ;;  %v3515_v8 = vpop.f32.mrb[28].mxu1  ;;  %v4047_v47 = vpop.eup %4046  ;;  %2854 = vst [vmem:[%s5120_s19 + $0x48] sm:$0xff] %v2822_v28  ;;  %v2733_v48 = vadd.f32 1.0, %v4045_v9 }
 0x20a   : > { %v5191_v18 = vadd.f32 %v3681_v21, %v5051_v22  ;;  %v1699_v27 = vpop.f32.mrb[29].mxu1  ;;  %v4049_v34 = vpop.eup %4048  ;;  %4066 = vrcp.f32 %v2735_v49  ;;  %v2736_v50 = vadd.f32 1.0, %v4047_v47  ;;  %v3185_v7 = vmul.f32 -1.442695, %v5183_v3 }
 0x20b   : > { %v5195_v20 = vadd.f32 %v3682_v46, %v5051_v22  ;;  %v3516_v44 = vpop.f32.mrb[30].mxu1  ;;  %v4051_v40 = vpop.eup %4050  ;;  %4068 = vrcp.f32 %v2733_v48  ;;  %v2734_v5 = vadd.f32 1.0, %v4049_v34  ;;  %v3183_v6 = vmul.f32 -1.442695, %v5187_v59 }
 0x20c   : > { %v1702_v54 = vpop.f32.mrb[31].mxu1  ;;  %v4053_v31 = vpop.eup %4052  ;;  %v2827_v11 = vmul.f32 %v4051_v40, %v5106_v61  ;;  %4070 = vrcp.f32 %v2736_v50  ;;  %v3186_v13 = vmul.f32 -1.442695, %v5191_v18 }
 0x20d   : > { %v3651_v38 = vpop.f32.mrb[28].mxu0  ;;  %v4055_v56 = vpop.eup %4054  ;;  %v2825_v43 = vmul.f32 %v4053_v31, %v5110_v14  ;;  %4072 = vrcp.f32 %v2734_v5  ;;  %v3184_v41 = vmul.f32 -1.442695, %v5195_v20 }
 0x20e   : > { %v3683_v4 = vadd.f32 %v3651_v38, %v3515_v8  ;;  %v2535_v2 = vpop.f32.mrb[29].mxu0  ;;  %v4057_v25 = vpop.eup %4056  ;;  %2859 = vst [vmem:[%s5120_s19 + $0x70] sm:$0xff] %v2827_v11  ;;  %v2828_v12 = vmul.f32 %v4055_v56, %v5115_v63  ;;  %4074 = vpow2.f32 %v3185_v7 }
 0x20f   : > { %v3684_v61 = vadd.f32 %v2535_v2, %v1699_v27  ;;  %v3652_v58 = vpop.f32.mrb[30].mxu0  ;;  %v4059_v42 = vpop.eup %4058  ;;  %2857 = vst [vmem:[%s5120_s19 + $0x60] sm:$0xff] %v2825_v43  ;;  %v2826_v16 = vmul.f32 %v4057_v25, %v5124_v55  ;;  %4076 = vpow2.f32 %v3183_v6 }
 0x210   : > { %v5207_v14 = vadd.f32 %v3683_v4, %v5051_v22  ;;  %v3685_v23 = vadd.f32 %v3652_v58, %v3516_v44  ;;  %v2538_v51 = vpop.f32.mrb[31].mxu0  ;;  %v4061_v26 = vpop.eup %4060  ;;  %2860 = vst [vmem:[%s5120_s19 + $0x78] sm:$0xff] %v2828_v12  ;;  %v2739_v57 = vadd.f32 1.0, %v4059_v42  ;;  %4078 = vpow2.f32 %v3186_v13 }
 0x211   : > { %v5211_v63 = vadd.f32 %v3684_v61, %v5051_v22  ;;  %v3686_v30 = vadd.f32 %v2538_v51, %v1702_v54  ;;  %v4063_v53 = vpop.eup %4062  ;;  %2858 = vst [vmem:[%s5120_s19 + $0x68] sm:$0xff] %v2826_v16  ;;  %v2737_v24 = vadd.f32 1.0, %v4061_v26  ;;  %4080 = vpow2.f32 %v3184_v41 }
 0x212   : > { %v5215_v55 = vadd.f32 %v3685_v23, %v5051_v22  ;;  %v4065_v32 = vpop.eup %4064  ;;  %4082 = vrcp.f32 %v2739_v57  ;;  %v2740_v62 = vadd.f32 1.0, %v4063_v53  ;;  %v3189_v33 = vmul.f32 -1.442695, %v5207_v14 }
 0x213   : > { %v5219_v45 = vadd.f32 %v3686_v30, %v5051_v22  ;;  %4084 = vrcp.f32 %v2737_v24  ;;  %v2738_v39 = vadd.f32 1.0, %v4065_v32  ;;  %v3187_v19 = vmul.f32 -1.442695, %v5211_v63 }
 0x214   : > { %v4067_v36 = vpop.eup %4066  ;;  %4086 = vrcp.f32 %v2740_v62  ;;  %v3190_v29 = vmul.f32 -1.442695, %v5215_v55 }
 0x215   : > { %v4069_v28 = vpop.eup %4068  ;;  %v2831_v21 = vmul.f32 %v4067_v36, %v5136_v37  ;;  %4088 = vrcp.f32 %v2738_v39  ;;  %v3188_v60 = vmul.f32 -1.442695, %v5219_v45 }
 0x216   : > { %v4071_v9 = vpop.eup %4070  ;;  %v2829_v22 = vmul.f32 %v4069_v28, %v5140_v52  ;;  %4090 = vpow2.f32 %v3189_v33 }
 0x217   : > { %v4073_v49 = vpop.eup %4072  ;;  %2863 = vst [vmem:[%s5120_s19 + $0x90] sm:$0xff] %v2831_v21  ;;  %v2832_v46 = vmul.f32 %v4071_v9, %v5144_v17  ;;  %4092 = vpow2.f32 %v3187_v19 }
 0x218   : > { %v4075_v8 = vpop.eup %4074  ;;  %2861 = vst [vmem:[%s5120_s19 + $0x80] sm:$0xff] %v2829_v22  ;;  %v2830_v47 = vmul.f32 %v4073_v49, %v5148_v0  ;;  %4094 = vpow2.f32 %v3190_v29 }
 0x219   : > { %v4077_v48 = vpop.eup %4076  ;;  %2864 = vst [vmem:[%s5120_s19 + $0x98] sm:$0xff] %v2832_v46  ;;  %v2743_v37 = vadd.f32 1.0, %v4075_v8  ;;  %4096 = vpow2.f32 %v3188_v60 }
 0x21a   : > { %v4079_v27 = vpop.eup %4078  ;;  %2862 = vst [vmem:[%s5120_s19 + $0x88] sm:$0xff] %v2830_v47  ;;  %v2741_v34 = vadd.f32 1.0, %v4077_v48 }
 0x21b   : > { %v4081_v52 = vpop.eup %4080  ;;  %4098 = vrcp.f32 %v2743_v37  ;;  %v2744_v50 = vadd.f32 1.0, %v4079_v27 }
 0x21c   : > { %v4083_v7 = vpop.eup %4082  ;;  %4100 = vrcp.f32 %v2741_v34  ;;  %v2742_v17 = vadd.f32 1.0, %v4081_v52 }
 0x21d   : > { %v4085_v44 = vpop.eup %4084  ;;  %v2835_v0 = vmul.f32 %v4083_v7, %v5160_v1  ;;  %4102 = vrcp.f32 %v2744_v50 }
 0x21e   : > { %v4087_v40 = vpop.eup %4086  ;;  %v2833_v5 = vmul.f32 %v4085_v44, %v5164_v35  ;;  %4104 = vrcp.f32 %v2742_v17 }
 0x21f   : > { %v4089_v6 = vpop.eup %4088  ;;  %2867 = vst [vmem:[%s5120_s19 + $0xb0] sm:$0xff] %v2835_v0  ;;  %v2836_v54 = vmul.f32 %v4087_v40, %v5168_v15 }
 0x220   : > { %v4091_v31 = vpop.eup %4090  ;;  %2865 = vst [vmem:[%s5120_s19 + $0xa0] sm:$0xff] %v2833_v5  ;;  %v2834_v11 = vmul.f32 %v4089_v6, %v5172_v10 }
 0x221   : > { %v4093_v13 = vpop.eup %4092  ;;  %2868 = vst [vmem:[%s5120_s19 + $0xb8] sm:$0xff] %v2836_v54  ;;  %v2747_v38 = vadd.f32 1.0, %v4091_v31 }
 0x222   : > { %v4095_v56 = vpop.eup %4094  ;;  %2866 = vst [vmem:[%s5120_s19 + $0xa8] sm:$0xff] %v2834_v11  ;;  %v2745_v1 = vadd.f32 1.0, %v4093_v13 }
 0x223   : > { %v4097_v43 = vpop.eup %4096  ;;  %4106 = vrcp.f32 %v2747_v38  ;;  %v2748_v35 = vadd.f32 1.0, %v4095_v56 }
 0x224   : > { %4108 = vrcp.f32 %v2745_v1  ;;  %v2746_v41 = vadd.f32 1.0, %v4097_v43 }
 0x225   : > { %v4099_v15 = vpop.eup %4098  ;;  %4110 = vrcp.f32 %v2748_v35 }
 0x226   : > { %v4101_v4 = vpop.eup %4100  ;;  %v2839_v10 = vmul.f32 %v4099_v15, %v5183_v3  ;;  %4112 = vrcp.f32 %v2746_v41 }
 0x227   : > { %v4103_v2 = vpop.eup %4102  ;;  %v2837_v25 = vmul.f32 %v4101_v4, %v5187_v59 }
 0x228   : > { %v4105_v12 = vpop.eup %4104  ;;  %2871 = vst [vmem:[%s5120_s19 + $0xd0] sm:$0xff] %v2839_v10  ;;  %v2840_v61 = vmul.f32 %v4103_v2, %v5191_v18 }
 0x229   : > { %2869 = vst [vmem:[%s5120_s19 + $0xc0] sm:$0xff] %v2837_v25  ;;  %v2838_v58 = vmul.f32 %v4105_v12, %v5195_v20 }
 0x22a   : > { %2872 = vst [vmem:[%s5120_s19 + $0xd8] sm:$0xff] %v2840_v61 }
 0x22b   : > { %2870 = vst [vmem:[%s5120_s19 + $0xc8] sm:$0xff] %v2838_v58 }
 0x22d   : > { %v4107_v42 = vpop.eup %4106 }
 0x22e   : > { %v4109_v16 = vpop.eup %4108  ;;  %v2843_v3 = vmul.f32 %v4107_v42, %v5207_v14 }
 0x22f   : > { %v4111_v23 = vpop.eup %4110  ;;  %v2841_v51 = vmul.f32 %v4109_v16, %v5211_v63 }
 0x230   : > { %v4113_v59 = vpop.eup %4112  ;;  %2875 = vst [vmem:[%s5120_s19 + $0xf0] sm:$0xff] %v2843_v3  ;;  %v2844_v26 = vmul.f32 %v4111_v23, %v5215_v55 }
 0x231   : > { %2873 = vst [vmem:[%s5120_s19 + $0xe0] sm:$0xff] %v2841_v51  ;;  %v2842_v18 = vmul.f32 %v4113_v59, %v5219_v45 }
 0x232   : > { %2876 = vst [vmem:[%s5120_s19 + $0xf8] sm:$0xff] %v2844_v26 }
 0x233   : > { %2874 = vst [vmem:[%s5120_s19 + $0xe8] sm:$0xff] %v2842_v18 }
 0x234 PF: > { %s13_s14 = sadd.s32 1, %s4136_s14   ;;  %s5352_s12 = smov %s4132_s13 }
 0x235   : > { %p10_p5 = scmp.ge.s32.totalorder %s13_s14, 4   ;;  %s5353_s13 = smov %s5355_s15 }
 0x237   :  { %12 = sbr.rel (!%p10_p5) target bundleno = 2 (0x2), region = 68 }

</bundles_post_ra>
